<compile_context>
chip_gen: v7x
topology: tpu7x:2x2x1
jax: 0.10.0
libtpu: 0.0.40
codegen_flags: <defaults>
</compile_context>

<pallas_src>
import functools

import jax
import jax.numpy as jnp
from jax.experimental import pallas as pl
from jax.experimental.pallas import tpu as pltpu


def _attention_mil_kernel(h_ref, w1t_ref, b1_ref, w2_ref, b2_ref, wc_ref, bc_ref,
                          y_ref, s_ref, m_sc, l_sc, macc_sc,
                          *, n_total, tile_n, needs_mask, chunked):
    """One grid step: bag `b = program_id(0)`, instance tile `n = program_id(1)`.

    h_ref    : (L, tile_n)   current instance tile of the bag (native layout)
    w1t_ref  : (D, L)        attention Linear(L->D) weight (out, in)
    b1_ref   : (D, 1)        its bias (column)
    w2_ref   : (D, 1)        attention Linear(D->1) weight (column)
    b2_ref   : (1,)  SMEM    its bias (scalar)
    wc_ref   : (L, C)        classifier weight (transposed)
    bc_ref   : (1, C)        classifier bias
    y_ref    : (1, C)        Y_out accumulator-output (written on last tile only)
    s_ref    : (1, tile_n)   raw pre-softmax attention scores (lane-dense)
    m_sc/l_sc                online-softmax running max / denominator
    macc_sc  : (L, 128|1)    running weighted-sum of instances (lane-group partials)
    """
    n = pl.program_id(1)

    @pl.when(n == 0)
    def _init():
        m_sc[...] = jnp.full_like(m_sc, -jnp.inf)
        l_sc[...] = jnp.zeros_like(l_sc)
        macc_sc[...] = jnp.zeros_like(macc_sc)

    h = h_ref[...]                                                   # (L, tile_n), streamed dtype

    # Attention MLP on the native layout: z = tanh(W1 @ h + b1)  -> (D, tile_n)
    # Single dense MXU matmul per tile; stays native bf16 x bf16 -> f32 when streaming bf16.
    z = jnp.tanh(
        jnp.dot(w1t_ref[...], h, preferred_element_type=jnp.float32)
        + b1_ref[...].astype(jnp.float32)
    )

    # scores s = w2 . z + b2  -> (1, tile_n): VPU multiply + small sublane reduce
    # (avoids a width-1 MXU matmul)
    s = jnp.sum(z * w2_ref[...].astype(jnp.float32), axis=0, keepdims=True) + b2_ref[0]

    if needs_mask:
        # Only reached when the wrapper could not pick a tile that divides N.
        col = jax.lax.broadcasted_iota(jnp.int32, (1, tile_n), 1) + n * tile_n
        valid = col < n_total
        s = jnp.where(valid, s, -jnp.inf)

    # Emit raw scores lane-dense; the wrapper softmaxes them to produce A exactly.
    s_ref[...] = s.astype(s_ref.dtype)

    # Online (flash-style) softmax accumulation of M = sum_i softmax(s)_i * h[:, i]
    m_prev = m_sc[...]                                               # (1, 1)
    m_new = jnp.maximum(m_prev, jnp.max(s, axis=1, keepdims=True))   # (1, 1)
    alpha = jnp.exp(m_prev - m_new)                                  # (1, 1)
    e = jnp.exp(s - m_new)                                           # (1, tile_n)

    if chunked:
        # Lane-group accumulation: per-128-lane VPU multiply-adds into an (L, 128)
        # fp32 partial.  No per-tile cross-lane (XLU) reduce and no full L x tile_n
        # fp32 intermediate; the single (L,128)->(L,1) reduce is deferred to finalize.
        partial = None
        for g in range(tile_n // 128):
            lo, hi = g * 128, (g + 1) * 128
            chunk = h[:, lo:hi] * e[:, lo:hi]                        # promoted to fp32
            if needs_mask:
                chunk = jnp.where(valid[:, lo:hi], chunk, 0.0)       # guard garbage lanes
            partial = chunk if partial is None else partial + chunk
        macc_sc[...] = alpha * macc_sc[...] + partial                # (L, 128)
    else:
        # Single small (non-lane-aligned) tile: direct lane reduce, once per bag.
        contrib = h.astype(jnp.float32) * e                          # (L, tile_n)
        if needs_mask:
            contrib = jnp.where(valid, contrib, 0.0)
        macc_sc[...] = alpha * macc_sc[...] + jnp.sum(contrib, axis=1, keepdims=True)

    l_sc[...] = alpha * l_sc[...] + jnp.sum(e, axis=1, keepdims=True)
    m_sc[...] = m_new

    @pl.when(n == pl.num_programs(1) - 1)
    def _finalize():
        macc = macc_sc[...]
        if chunked:
            macc = jnp.sum(macc, axis=1, keepdims=True)              # one XLU reduce / bag
        # M = macc / l  (exact divide; once per bag)
        m_pooled = macc * pl.reciprocal(l_sc[...], approx=False)     # (L, 1)
        # classifier Linear(L -> C): VPU multiply + sublane reduce (no degenerate MXU push)
        y = (jnp.sum(m_pooled * wc_ref[...].astype(jnp.float32), axis=0, keepdims=True)
             + bc_ref[...].astype(jnp.float32))                      # (1, C)
        y_ref[...] = y.astype(y_ref.dtype)


def _choose_tile_n(N, L, D, dtype_bytes, max_tile_n, vmem_budget_bytes):
    """Pick the instance-axis tile.  Returns (tile_n, needs_mask)."""

    def est(t):
        # double-buffered H tile + double-buffered score tile + z fp32 intermediate
        # + double-buffered weights + macc scratch / one lane-group chunk.
        return (2 * L * t * dtype_bytes
                + 2 * t * 4
                + D * t * 4
                + 2 * (D * L * dtype_bytes + L * 8 * 4)
                + 2 * L * 128 * 4)

    # Whole bag as a single tile whenever it fits: one grid step, no tail, no mask.
    if N <= max_tile_n and est(N) <= vmem_budget_bytes:
        return N, False

    # Otherwise: largest lane-aligned (multiple-of-128) tile under the VMEM budget.
    floor = 512 if dtype_bytes <= 2 else 256        # keep each DMA'd row >= ~1 KiB
    cap = max(128, (min(max_tile_n, N) // 128) * 128)
    while cap > 128 and est(cap) > vmem_budget_bytes:
        cap -= 128
    if N % 128 == 0:
        # Prefer a tile that divides N (kills the per-tile ragged mask) as long as it
        # does not fall below the contiguous-DMA floor.
        t = cap
        while N % t != 0:
            t -= 128
        if t >= min(floor, cap):
            return t, False
    return cap, True


def attention_mil_forward(H, params, *, max_tile_n=2048, stream_dtype=None,
                          vmem_budget_bytes=48 * 1024 * 1024):
    """H: (B, L, N) in its native layout (same tensor the PyTorch module receives).

    stream_dtype: optionally cast H / W1^T (e.g. to jnp.bfloat16) before streaming —
    the kernel is HBM-bound on H, so this halves its bytes; fp32 accumulation in-kernel.
    Returns (Y_out (B, C), Y_hat, A (B, N, 1)) matching Attention.forward.
    """
    w1t, b1, w2, b2, wc, bc = params
    B, L, N = H.shape
    D = w1t.shape[0]
    C = wc.shape[1]

    if stream_dtype is not None:
        H = H.astype(stream_dtype)
    dtype_bytes = jnp.dtype(H.dtype).itemsize

    tile_n, needs_mask = _choose_tile_n(N, L, D, dtype_bytes, max_tile_n, vmem_budget_bytes)
    n_tiles = pl.cdiv(N, tile_n)
    chunked = (tile_n % 128 == 0)
    acc_w = 128 if chunked else 1

    # Stream the big operands in H's dtype (bf16 x bf16 -> f32 on the MXU when bf16);
    # small vectors in fp32.
    w1t_c = w1t.astype(H.dtype)
    b1_c = b1.astype(jnp.float32)
    w2_c = w2.astype(jnp.float32)
    wc_c = wc.astype(jnp.float32)
    bc_c = bc.astype(jnp.float32)
    b2_s = jnp.asarray(b2, jnp.float32).reshape((1,))        # scalar bias -> SMEM

    kernel = functools.partial(_attention_mil_kernel, n_total=N, tile_n=tile_n,
                               needs_mask=needs_mask, chunked=chunked)

    # Advisory cost estimate so XLA schedules neighbours of this HBM-bound call sanely.
    cost = pl.CostEstimate(
        flops=int(B * N * (2 * D * L + 2 * D + 2 * L) + 2 * B * L * C),
        transcendentals=int(B * N * (D + 1)),
        bytes_accessed=int(B * L * N * dtype_bytes + B * N * 4 + B * C * 4
                           + D * L * dtype_bytes + (2 * D + L * C + C + 1) * 4),
    )

    # NOTE: the weight blocks (W1^T, b1, w2, Wc, bc) have grid-invariant index maps, so
    # they are DMA'd once; we skip pipeline_mode=pl.Buffered(1) — the VMEM it would
    # reclaim is small relative to the H tiles at these shapes.
    # TODO(synk): v7x megacore coverage when B == 1 would need a second parallel axis
    # splitting the N range with per-core partial (m, l, macc) outputs + a tiny
    # flash-style combine in the wrapper; omitted here.
    y_out, scores = pl.pallas_call(
        kernel,
        out_shape=(
            jax.ShapeDtypeStruct((B, 1, C), jnp.float32),    # Y_out
            jax.ShapeDtypeStruct((B, 1, N), jnp.float32),    # raw scores (lane-dense)
        ),
        grid_spec=pltpu.PrefetchScalarGridSpec(
            num_scalar_prefetch=0,
            grid=(B, n_tiles),
            in_specs=[
                pl.BlockSpec((None, L, tile_n), lambda b, n: (b, 0, n)),   # H bag tile
                pl.BlockSpec((D, L), lambda b, n: (0, 0)),                 # W1^T
                pl.BlockSpec((D, 1), lambda b, n: (0, 0)),                 # b1
                pl.BlockSpec((D, 1), lambda b, n: (0, 0)),                 # w2
                pl.BlockSpec(memory_space=pltpu.MemorySpace.SMEM),         # b2 (scalar)
                pl.BlockSpec((L, C), lambda b, n: (0, 0)),                 # Wc
                pl.BlockSpec((1, C), lambda b, n: (0, 0)),                 # bc
            ],
            out_specs=[
                pl.BlockSpec((None, 1, C), lambda b, n: (b, 0, 0)),        # Y_out (accum.)
                pl.BlockSpec((None, 1, tile_n), lambda b, n: (b, 0, n)),   # scores
            ],
            scratch_shapes=[
                pltpu.VMEM((1, 1), jnp.float32),          # running max
                pltpu.VMEM((1, 1), jnp.float32),          # running denom
                pltpu.VMEM((L, acc_w), jnp.float32),      # running weighted sum (lane groups)
            ],
        ),
        compiler_params=pltpu.CompilerParams(
            dimension_semantics=("parallel", "arbitrary"),
            vmem_limit_bytes=int(vmem_budget_bytes),
        ),
        cost_estimate=cost,
    )(H, w1t_c, b1_c, w2_c, b2_s, wc_c, bc_c)

    # Glue: exact softmax over instances on the tiny (B, N) score matrix -> A (B, N, 1).
    A = jax.nn.softmax(scores, axis=-1).reshape(B, N, 1)
    y_out = y_out.reshape(B, C)
    # Matches the module exactly: argmax when classes > 1, else Y_hat is Y_out itself.
    y_hat = jnp.argmax(y_out, axis=1) if C > 1 else y_out
    # TODO(synk): A.register_hook gradient capture has no forward-pass equivalent; skipped.
    return y_out, y_hat, A


def init_params(key, L, D, C):
    k1, k2, k3, k4, k5, k6 = jax.random.split(key, 6)
    w1t = jax.random.normal(k1, (D, L), jnp.float32) * 0.05   # Linear(L->D) weight (out,in)
    b1 = jax.random.normal(k2, (D, 1), jnp.float32) * 0.05
    w2 = jax.random.normal(k3, (D, 1), jnp.float32) * 0.05    # Linear(D->1) weight (col)
    b2 = jax.random.normal(k4, (1, 1), jnp.float32) * 0.05
    wc = jax.random.normal(k5, (L, C), jnp.float32) * 0.05    # classifier weight^T
    bc = jax.random.normal(k6, (1, C), jnp.float32) * 0.05
    return w1t, b1, w2, b2, wc, bc


def _reference(H, params):
    w1t, b1, w2, b2, wc, bc = params
    Hp = jnp.transpose(H, (0, 2, 1)).astype(jnp.float32)     # (B, N, L)
    z = jnp.tanh(Hp @ w1t.T + b1.T)                          # (B, N, D)
    s = z @ w2 + b2                                          # (B, N, 1)
    A = jax.nn.softmax(s, axis=1)                            # (B, N, 1)
    M = jnp.einsum('abc,abd->ad', A, Hp)                     # (B, L)
    Y = M @ wc + bc                                          # (B, C)
    return Y, jnp.argmax(Y, axis=1), A


if __name__ == "__main__":
    # Small but representative shapes: batch=2, hidden_dim L=256, N=256 instances/bag,
    # intermediate D=64, 2 classes.
    B, L, N = 2, 256, 256
    D, C = 64, 2

    key = jax.random.PRNGKey(0)
    k_x, k_x2, k_p = jax.random.split(key, 3)
    H = jax.random.normal(k_x, (B, L, N), jnp.float32)
    params = init_params(k_p, L, D, C)
    y_ref, yhat_ref, a_ref = _reference(H, params)

    # 1) Multi-tile path (tile_n=128 -> 2 tiles): exercises the online-softmax
    #    accumulator + chunked lane-group pooling, fp32 streaming.
    y_out, y_hat, A = jax.block_until_ready(
        attention_mil_forward(H, params, max_tile_n=128))
    assert jnp.allclose(y_out, y_ref, atol=1e-4, rtol=1e-4), "Y_out mismatch (multi-tile)"
    assert jnp.allclose(A, a_ref, atol=1e-5), "A mismatch (multi-tile)"
    assert jnp.array_equal(y_hat, yhat_ref), "Y_hat mismatch (multi-tile)"

    # 2) Default config: whole bag as one large tile, single grid step per bag.
    y_out1, y_hat1, A1 = jax.block_until_ready(attention_mil_forward(H, params))
    assert jnp.allclose(y_out1, y_ref, atol=1e-4, rtol=1e-4), "Y_out mismatch (one-tile)"
    assert jnp.allclose(A1, a_ref, atol=1e-5), "A mismatch (one-tile)"
    assert jnp.array_equal(y_hat1, yhat_ref), "Y_hat mismatch (one-tile)"

    # 3) Ragged instance count (N=200, forced tile_n=128): exercises the guarded tail.
    Hr = jax.random.normal(k_x2, (B, L, 200), jnp.float32)
    yr_ref, yhr_ref, ar_ref = _reference(Hr, params)
    yr, yhr, Ar = jax.block_until_ready(
        attention_mil_forward(Hr, params, max_tile_n=128))
    assert jnp.allclose(yr, yr_ref, atol=1e-4, rtol=1e-4), "Y_out mismatch (ragged)"
    assert jnp.allclose(Ar, ar_ref, atol=1e-5), "A mismatch (ragged)"
    assert jnp.array_equal(yhr, yhr_ref), "Y_hat mismatch (ragged)"

    # 4) bf16 streaming option (bandwidth win); compare against a reference that sees
    #    the same bf16-rounded inputs (fp32 accumulation in both).
    yb, yhb, Ab = jax.block_until_ready(
        attention_mil_forward(H, params, stream_dtype=jnp.bfloat16))
    params_bf = (params[0].astype(jnp.bfloat16).astype(jnp.float32),) + params[1:]
    yb_ref, _, ab_ref = _reference(H.astype(jnp.bfloat16).astype(jnp.float32), params_bf)
    assert jnp.allclose(yb, yb_ref, atol=2e-2, rtol=2e-2), "Y_out mismatch (bf16 stream)"
    assert jnp.allclose(Ab, ab_ref, atol=1e-3), "A mismatch (bf16 stream)"

    print("KERNEL_OK")
</pallas_src>

<mosaic_0001>
module attributes {stable_mosaic.version = 11 : i64} {
  func.func @_attention_mil_kernel(%arg0: i32, %arg1: i32, %arg2: memref<1x256x128xf32, #tpu.memory_space<vmem>>, %arg3: memref<64x256xf32, #tpu.memory_space<vmem>>, %arg4: memref<64x1xf32, #tpu.memory_space<vmem>>, %arg5: memref<64x1xf32, #tpu.memory_space<vmem>>, %arg6: memref<1xf32, #tpu.memory_space<smem>>, %arg7: memref<256x2xf32, #tpu.memory_space<vmem>>, %arg8: memref<1x2xf32, #tpu.memory_space<vmem>>, %arg9: memref<1x1x2xf32, #tpu.memory_space<vmem>>, %arg10: memref<1x1x128xf32, #tpu.memory_space<vmem>>, %arg11: memref<1x1xf32, #tpu.memory_space<vmem>>, %arg12: memref<1x1xf32, #tpu.memory_space<vmem>>, %arg13: memref<256x128xf32, #tpu.memory_space<vmem>>) attributes {dimension_semantics = [#tpu.dimension_semantics<parallel>, #tpu.dimension_semantics<arbitrary>], iteration_bounds = array<i64: 2, 2>, scalar_prefetch = 0 : i64, scratch_operands = 3 : i64, tpu.core_type = #tpu.core_type<tc>, window_params = [{transform_indices = @transform_0, window_bounds = array<i64: 1, 256, 128>}, {pipeline_mode = #tpu.pipeline_mode<synchronous>, transform_indices = @transform_1, window_bounds = array<i64: 64, 256>}, {pipeline_mode = #tpu.pipeline_mode<synchronous>, transform_indices = @transform_2, window_bounds = array<i64: 64, 1>}, {pipeline_mode = #tpu.pipeline_mode<synchronous>, transform_indices = @transform_3, window_bounds = array<i64: 64, 1>}, {transform_indices = @transform_4, window_bounds = array<i64: 1>}, {pipeline_mode = #tpu.pipeline_mode<synchronous>, transform_indices = @transform_5, window_bounds = array<i64: 256, 2>}, {pipeline_mode = #tpu.pipeline_mode<synchronous>, transform_indices = @transform_6, window_bounds = array<i64: 1, 2>}, {transform_indices = @transform_7, window_bounds = array<i64: 1, 1, 2>}, {transform_indices = @transform_8, window_bounds = array<i64: 1, 1, 128>}]} {
    %c0_i32 = arith.constant 0 : i32
    %0 = arith.cmpi eq, %arg1, %c0_i32 : i32
    %1 = arith.extui %0 : i1 to i32
    %c0_i32_0 = arith.constant 0 : i32
    %2 = arith.cmpi ne, %1, %c0_i32_0 : i32
    scf.if %2 {
      %cst_29 = arith.constant 0xFF800000 : f32
      %48 = vector.broadcast %cst_29 : f32 to vector<1x1xf32>
      %c0_30 = arith.constant 0 : index
      %c0_31 = arith.constant 0 : index
      %49 = vector.load %arg11[%c0_30, %c0_31] : memref<1x1xf32, #tpu.memory_space<vmem>>, vector<1x1xf32>
      tpu.vector_store %arg11[%c0_30, %c0_31], %48 {strides = array<i32>} : memref<1x1xf32, #tpu.memory_space<vmem>>, vector<1x1xf32>,
      %cst_32 = arith.constant 0.000000e+00 : f32
      %50 = vector.broadcast %cst_32 : f32 to vector<1x1xf32>
      %c0_33 = arith.constant 0 : index
      %c0_34 = arith.constant 0 : index
      %51 = vector.load %arg12[%c0_33, %c0_34] : memref<1x1xf32, #tpu.memory_space<vmem>>, vector<1x1xf32>
      tpu.vector_store %arg12[%c0_33, %c0_34], %50 {strides = array<i32>} : memref<1x1xf32, #tpu.memory_space<vmem>>, vector<1x1xf32>,
      %cst_35 = arith.constant 0.000000e+00 : f32
      %52 = vector.broadcast %cst_35 : f32 to vector<256x128xf32>
      %c0_36 = arith.constant 0 : index
      %c0_37 = arith.constant 0 : index
      %53 = vector.load %arg13[%c0_36, %c0_37] : memref<256x128xf32, #tpu.memory_space<vmem>>, vector<256x128xf32>
      tpu.vector_store %arg13[%c0_36, %c0_37], %52 {strides = array<i32>} : memref<256x128xf32, #tpu.memory_space<vmem>>, vector<256x128xf32>,
    } else {
    }
    %c0 = arith.constant 0 : index
    %c0_1 = arith.constant 0 : index
    %c0_2 = arith.constant 0 : index
    %3 = vector.load %arg2[%c0, %c0_1, %c0_2] : memref<1x256x128xf32, #tpu.memory_space<vmem>>, vector<1x256x128xf32>
    %4 = vector.shape_cast %3 : vector<1x256x128xf32> to vector<256x128xf32>
    %c0_3 = arith.constant 0 : index
    %c0_4 = arith.constant 0 : index
    %5 = vector.load %arg3[%c0_3, %c0_4] : memref<64x256xf32, #tpu.memory_space<vmem>>, vector<64x256xf32>
    %cst = arith.constant dense<0.000000e+00> : vector<64x128xf32>
    %6 = tpu.matmul %5, %4, %cst {dimension_numbers = #tpu.dot_dimension_numbers<[1], [0], [0], [1], [0, 0, 1, 1], [], []>} : vector<64x256xf32>, vector<256x128xf32>, vector<64x128xf32> -> vector<64x128xf32>
    %c0_5 = arith.constant 0 : index
    %c0_6 = arith.constant 0 : index
    %7 = vector.load %arg4[%c0_5, %c0_6] : memref<64x1xf32, #tpu.memory_space<vmem>>, vector<64x1xf32>
    %8 = vector.broadcast %7 : vector<64x1xf32> to vector<64x128xf32>
    %9 = arith.addf %6, %8 : vector<64x128xf32>
    %10 = math.tanh %9 : vector<64x128xf32>
    %c0_7 = arith.constant 0 : index
    %c0_8 = arith.constant 0 : index
    %11 = vector.load %arg5[%c0_7, %c0_8] : memref<64x1xf32, #tpu.memory_space<vmem>>, vector<64x1xf32>
    %12 = vector.broadcast %11 : vector<64x1xf32> to vector<64x128xf32>
    %13 = arith.mulf %10, %12 : vector<64x128xf32>
    %cst_9 = arith.constant dense<0.000000e+00> : vector<128xf32>
    %14 = vector.multi_reduction <add>, %13, %cst_9 [0] : vector<64x128xf32> to vector<128xf32>
    %15 = vector.shape_cast %14 : vector<128xf32> to vector<1x128xf32>
    %c0_10 = arith.constant 0 : index
    %16 = memref.load %arg6[%c0_10] : memref<1xf32, #tpu.memory_space<smem>>
    %17 = vector.broadcast %16 : f32 to vector<1x128xf32>
    %18 = arith.addf %15, %17 : vector<1x128xf32>
    %c0_11 = arith.constant 0 : index
    %c0_12 = arith.constant 0 : index
    %c0_13 = arith.constant 0 : index
    %19 = vector.load %arg10[%c0_11, %c0_12, %c0_13] : memref<1x1x128xf32, #tpu.memory_space<vmem>>, vector<1x1x128xf32>
    %20 = vector.shape_cast %19 : vector<1x1x128xf32> to vector<1x128xf32>
    %21 = vector.shape_cast %18 : vector<1x128xf32> to vector<1x1x128xf32>
    tpu.vector_store %arg10[%c0_11, %c0_12, %c0_13], %21 {strides = array<i32>} : memref<1x1x128xf32, #tpu.memory_space<vmem>>, vector<1x1x128xf32>,
    %c0_14 = arith.constant 0 : index
    %c0_15 = arith.constant 0 : index
    %22 = vector.load %arg11[%c0_14, %c0_15] : memref<1x1xf32, #tpu.memory_space<vmem>>, vector<1x1xf32>
    %cst_16 = arith.constant dense<0xFF800000> : vector<1xf32>
    %23 = vector.multi_reduction <maximumf>, %18, %cst_16 [1] : vector<1x128xf32> to vector<1xf32>
    %24 = vector.shape_cast %23 : vector<1xf32> to vector<1x1xf32>
    %25 = arith.maximumf %22, %24 : vector<1x1xf32>
    %26 = arith.subf %22, %25 : vector<1x1xf32>
    %27 = math.exp %26 : vector<1x1xf32>
    %28 = vector.broadcast %25 : vector<1x1xf32> to vector<1x128xf32>
    %29 = arith.subf %18, %28 : vector<1x128xf32>
    %30 = math.exp %29 : vector<1x128xf32>
    %31 = vector.broadcast %30 : vector<1x128xf32> to vector<256x128xf32>
    %32 = arith.mulf %4, %31 : vector<256x128xf32>
    %c0_17 = arith.constant 0 : index
    %c0_18 = arith.constant 0 : index
    %33 = vector.load %arg13[%c0_17, %c0_18] : memref<256x128xf32, #tpu.memory_space<vmem>>, vector<256x128xf32>
    %34 = vector.broadcast %27 : vector<1x1xf32> to vector<256x128xf32>
    %35 = arith.mulf %34, %33 : vector<256x128xf32>
    %36 = arith.addf %35, %32 : vector<256x128xf32>
    %c0_19 = arith.constant 0 : index
    %c0_20 = arith.constant 0 : index
    %37 = vector.load %arg13[%c0_19, %c0_20] : memref<256x128xf32, #tpu.memory_space<vmem>>, vector<256x128xf32>
    tpu.vector_store %arg13[%c0_19, %c0_20], %36 {strides = array<i32>} : memref<256x128xf32, #tpu.memory_space<vmem>>, vector<256x128xf32>,
    %c0_21 = arith.constant 0 : index
    %c0_22 = arith.constant 0 : index
    %38 = vector.load %arg12[%c0_21, %c0_22] : memref<1x1xf32, #tpu.memory_space<vmem>>, vector<1x1xf32>
    %39 = arith.mulf %27, %38 : vector<1x1xf32>
    %cst_23 = arith.constant dense<0.000000e+00> : vector<1xf32>
    %40 = vector.multi_reduction <add>, %30, %cst_23 [1] : vector<1x128xf32> to vector<1xf32>
    %41 = vector.shape_cast %40 : vector<1xf32> to vector<1x1xf32>
    %42 = arith.addf %39, %41 : vector<1x1xf32>
    %c0_24 = arith.constant 0 : index
    %c0_25 = arith.constant 0 : index
    %43 = vector.load %arg12[%c0_24, %c0_25] : memref<1x1xf32, #tpu.memory_space<vmem>>, vector<1x1xf32>
    tpu.vector_store %arg12[%c0_24, %c0_25], %42 {strides = array<i32>} : memref<1x1xf32, #tpu.memory_space<vmem>>, vector<1x1xf32>,
    %c0_26 = arith.constant 0 : index
    %c0_27 = arith.constant 0 : index
    %44 = vector.load %arg11[%c0_26, %c0_27] : memref<1x1xf32, #tpu.memory_space<vmem>>, vector<1x1xf32>
    tpu.vector_store %arg11[%c0_26, %c0_27], %25 {strides = array<i32>} : memref<1x1xf32, #tpu.memory_space<vmem>>, vector<1x1xf32>,
    %c1_i32 = arith.constant 1 : i32
    %45 = arith.cmpi eq, %arg1, %c1_i32 : i32
    %46 = arith.extui %45 : i1 to i32
    %c0_i32_28 = arith.constant 0 : i32
    %47 = arith.cmpi ne, %46, %c0_i32_28 : i32
    scf.if %47 {
      %c0_29 = arith.constant 0 : index
      %c0_30 = arith.constant 0 : index
      %48 = vector.load %arg13[%c0_29, %c0_30] : memref<256x128xf32, #tpu.memory_space<vmem>>, vector<256x128xf32>
      %cst_31 = arith.constant dense<0.000000e+00> : vector<256xf32>
      %49 = vector.multi_reduction <add>, %48, %cst_31 [1] : vector<256x128xf32> to vector<256xf32>
      %50 = vector.shape_cast %49 : vector<256xf32> to vector<256x1xf32>
      %c0_32 = arith.constant 0 : index
      %c0_33 = arith.constant 0 : index
      %51 = vector.load %arg12[%c0_32, %c0_33] : memref<1x1xf32, #tpu.memory_space<vmem>>, vector<1x1xf32>
      %52 = tpu.reciprocal %51 : vector<1x1xf32> -> vector<1x1xf32>
      %53 = vector.broadcast %52 : vector<1x1xf32> to vector<256x1xf32>
      %54 = arith.mulf %50, %53 : vector<256x1xf32>
      %c0_34 = arith.constant 0 : index
      %c0_35 = arith.constant 0 : index
      %55 = vector.load %arg7[%c0_34, %c0_35] : memref<256x2xf32, #tpu.memory_space<vmem>>, vector<256x2xf32>
      %56 = vector.broadcast %54 : vector<256x1xf32> to vector<256x2xf32>
      %57 = arith.mulf %56, %55 : vector<256x2xf32>
      %cst_36 = arith.constant dense<0.000000e+00> : vector<2xf32>
      %58 = vector.multi_reduction <add>, %57, %cst_36 [0] : vector<256x2xf32> to vector<2xf32>
      %59 = vector.shape_cast %58 : vector<2xf32> to vector<1x2xf32>
      %c0_37 = arith.constant 0 : index
      %c0_38 = arith.constant 0 : index
      %60 = vector.load %arg8[%c0_37, %c0_38] : memref<1x2xf32, #tpu.memory_space<vmem>>, vector<1x2xf32>
      %61 = arith.addf %59, %60 : vector<1x2xf32>
      %c0_39 = arith.constant 0 : index
      %c0_40 = arith.constant 0 : index
      %c0_41 = arith.constant 0 : index
      %62 = vector.load %arg9[%c0_39, %c0_40, %c0_41] : memref<1x1x2xf32, #tpu.memory_space<vmem>>, vector<1x1x2xf32>
      %63 = vector.shape_cast %62 : vector<1x1x2xf32> to vector<1x2xf32>
      %64 = vector.shape_cast %61 : vector<1x2xf32> to vector<1x1x2xf32>
      tpu.vector_store %arg9[%c0_39, %c0_40, %c0_41], %64 {strides = array<i32>} : memref<1x1x2xf32, #tpu.memory_space<vmem>>, vector<1x1x2xf32>,
    } else {
    }
    return
  }
  func.func @transform_0(%arg0: i32, %arg1: i32) -> (i32, i32, i32) {
    %c0_i32 = arith.constant 0 : i32
    %c0_i32_0 = arith.constant 0 : i32
    return %arg0, %c0_i32, %arg1 : i32, i32, i32
  }
  func.func @transform_1(%arg0: i32, %arg1: i32) -> (i32, i32) {
    %c0_i32 = arith.constant 0 : i32
    %c0_i32_0 = arith.constant 0 : i32
    %c0_i32_1 = arith.constant 0 : i32
    return %c0_i32, %c0_i32_0 : i32, i32
  }
  func.func @transform_2(%arg0: i32, %arg1: i32) -> (i32, i32) {
    %c0_i32 = arith.constant 0 : i32
    %c0_i32_0 = arith.constant 0 : i32
    %c0_i32_1 = arith.constant 0 : i32
    return %c0_i32, %c0_i32_0 : i32, i32
  }
  func.func @transform_3(%arg0: i32, %arg1: i32) -> (i32, i32) {
    %c0_i32 = arith.constant 0 : i32
    %c0_i32_0 = arith.constant 0 : i32
    %c0_i32_1 = arith.constant 0 : i32
    return %c0_i32, %c0_i32_0 : i32, i32
  }
  func.func @transform_4(%arg0: i32, %arg1: i32) -> i32 {
    %c0_i32 = arith.constant 0 : i32
    %c0_i32_0 = arith.constant 0 : i32
    return %c0_i32 : i32
  }
  func.func @transform_5(%arg0: i32, %arg1: i32) -> (i32, i32) {
    %c0_i32 = arith.constant 0 : i32
    %c0_i32_0 = arith.constant 0 : i32
    %c0_i32_1 = arith.constant 0 : i32
    return %c0_i32, %c0_i32_0 : i32, i32
  }
  func.func @transform_6(%arg0: i32, %arg1: i32) -> (i32, i32) {
    %c0_i32 = arith.constant 0 : i32
    %c0_i32_0 = arith.constant 0 : i32
    %c0_i32_1 = arith.constant 0 : i32
    return %c0_i32, %c0_i32_0 : i32, i32
  }
  func.func @transform_7(%arg0: i32, %arg1: i32) -> (i32, i32, i32) {
    %c0_i32 = arith.constant 0 : i32
    %c0_i32_0 = arith.constant 0 : i32
    %c0_i32_1 = arith.constant 0 : i32
    return %arg0, %c0_i32, %c0_i32_0 : i32, i32, i32
  }
  func.func @transform_8(%arg0: i32, %arg1: i32) -> (i32, i32, i32) {
    %c0_i32 = arith.constant 0 : i32
    %c0_i32_0 = arith.constant 0 : i32
    return %arg0, %c0_i32, %arg1 : i32, i32, i32
  }
}

</mosaic_0001>

<bundles_post_ra>
// kernel: tpu_custom_call.1
= control target key start
LH: loop header
LB: loop body
LE: loop exit
PB: predicated region body
PF: predicated region fallthrough
CT: control target
= control target key end

     0   :  { %s2761_s0 = inlined_call_operand.hbm [shape: f32[2,256,256], index: 0, kind: input, shape index: {}]   ;;  %s2762_s1 = inlined_call_operand.vmem [shape: f32[64,256], index: 1, kind: input, shape index: {}]   ;;  %s2763_s2 = inlined_call_operand.vmem [shape: f32[64,1], index: 2, kind: input, shape index: {}]   ;;  %s2764_s3 = inlined_call_operand.vmem [shape: f32[64,1], index: 3, kind: input, shape index: {}]   ;;  %s2765_s4 = inlined_call_operand.<no memory space> [shape: f32[1], index: 4, kind: input, shape index: {}]   ;;  %s2766_s5 = inlined_call_operand.vmem [shape: f32[256,2], index: 5, kind: input, shape index: {}]   ;;  %s2767_s6 = inlined_call_operand.vmem [shape: f32[1,2], index: 6, kind: input, shape index: {}]   ;;  %s2768_s7 = inlined_call_operand.hbm [shape: f32[2,1,2], index: 7, kind: output, shape index: {0}]   ;;  %s2769_s8 = inlined_call_operand.hbm [shape: f32[2,1,256], index: 8, kind: output, shape index: {1}]  }
   0x1   :  { %2784 = sst [smem:[#allocation44_spill]] %s2761_s0 }
   0x2   :  { %2785 = sst [smem:[#allocation45_spill]] %s2762_s1 }
   0x3   :  { %2786 = sst [smem:[#allocation46_spill]] %s2769_s8 }
   0x4   :  { %14 = sst [smem:[#allocation5]] %s2765_s4 }
   0x5   :  { %15 = vsyncpa [#allocation7], 0 }
   0x6   :  { %17 = vsyncpa [#allocation7 + $0x1], 0 }
   0x7   :  { %18 = vsyncpa [#allocation8], 0 }
   0x8   :  { %20 = vsyncpa [#allocation8 + $0x1], 0 }
   0x9   :  { %21 = vsyncpa [#allocation11], 0 }
   0xa   :  { %23 = vsyncpa [#allocation11 + $0x1], 0  ;;  %s1951_s29 = smov 0   ;;  %s1953_s30 = smov 0  }
   0xb   :  { %s1955_s9 = smov 0   ;;  %s1957_s10 = smov 0  }
   0xc   :  { %s1959_s11 = smov 0   ;;  %s1961_s12 = smov 0  }
   0xd   :  { %s1963_s13 = smov 0   ;;  %s1965_s4 = smov 0  }
   0xe   :  { %s1967_s14 = smov 0   ;;  %s1969_s15 = smov 0  }
   0xf   :  { %s1971_s16 = smov 0  }
  0x10 LB: > { %2787 = sst [smem:[#allocation15_spill]] %s1851_s29  ;;  %s1447_s17 = sadd.s32 4294967295, %s1891_s16   ;;  %s1891_s16 = sphi %s1971_s16, %s29_s16   ;;  %s1887_s15 = sphi %s1969_s15, %s2868_s15   ;;  %s1883_s14 = sphi %s1967_s14, %s2867_s14   ;;  %s1879_s4 = sphi %s1965_s4, %s2866_s4   ;;  %s1875_s13 = sphi %s1963_s13, %s2865_s13   ;;  %s1871_s12 = sphi %s1961_s12, %s2858_s12   ;;  %s1867_s11 = sphi %s1959_s11, %s2864_s11   ;;  %s1863_s10 = sphi %s1957_s10, %s2863_s10   ;;  %s1859_s9 = sphi %s1955_s9, %s2856_s9   ;;  %s1855_s30 = sphi %s1953_s30, %s2862_s30   ;;  %s1851_s29 = sphi %s1951_s29, %s2861_s29  }
  0x11   : > { %2788 = sst [smem:[#allocation16_spill]] %s1859_s9  ;;  %s1448_s18 = sadd.s32 4294967294, %s1891_s16  }
  0x12   : > { %2789 = sst [smem:[#allocation17_spill]] %s1871_s12  ;;  %s38_s19 = sadd.s32 1, %s1883_s14 }
  0x13   : > { %s41_s20 = sadd.s32 1, %s1887_s15  ;;  %p39_p0 = scmp.ge.s32.totalorder %s38_s19, 2 }
  0x14   : > { %s50_s21 = sadd.s32 1, %s1871_s12  ;;  %p57_p1 = scmp.ne.s32.totalorder %s1871_s12, %s1867_s11 }
  0x15   : > { %p58_p2 = scmp.eq.s32.totalorder %s1891_s16, 0  ;;  %s2870_s19 = smov (%p39_p0, %s38_s19), 0 }
  0x16   : > { %2790 = sst [smem:[#allocation18_spill]] %s2870_s19  ;;  %s2872_s20 = smov (!%p39_p0, %s41_s20), %s1887_s15 }
  0x17   : > { %s46_s22 = ssub.s32 %s1883_s14, %s2870_s19  ;;  %p2022_p3 = por %p58_p2, %p57_p1 }
  0x18   : > { %p43_p4 = scmp.ge.s32.totalorder %s2872_s20, 2  ;;  %p63_p5 = scmp.ne.s32.totalorder %s1867_s11, %s1863_s10 }
  0x19   : > { %p64_p6 = scmp.eq.s32.totalorder %s1447_s17, 0  ;;  %s202_s24 = sadd.s32 1, %s1859_s9 }
  0x1a   : > { %s2874_s20 = smov (%p43_p4, %s2872_s20), 0  ;;  %p212_p8 = scmp.ne.s32.totalorder %s1859_s9, %s1855_s30 }
  0x1b   : > { %2792 = sst [smem:[#allocation19_spill]] %s2874_s20  ;;  %p2034_p7 = por %p64_p6, %p63_p5 }
  0x1c   : > { %s45_s26 = ssub.s32 %s1887_s15, %s2874_s20  ;;  %p213_p9 = scmp.eq.s32.totalorder %s1447_s17, 3 }
  0x1d   : > { %s47_s27 = sor.u32 %s46_s22, %s45_s26  ;;  %p200_p10 = scmp.eq.s32.totalorder %s45_s26, 0 }
  0x1e   : > { %p48_p11 = scmp.eq.s32.totalorder %s47_s27, 0  ;;  %p2042_p12 = por %p213_p9, %p212_p8 }
  0x1f   : > { %s2047_s19 = scalar_select %p200_p10, %s1859_s9, %s202_s24  }
  0x20   : > { %s2794_s28 = scalar_select %p2042_p12, 1, 0 }
  0x21   : > { %2795 = sst [smem:[#allocation20_spill]] %s2047_s19  ;;  %p218_p13 = scmp.ne.s32.totalorder %s1855_s30, %s1851_s29 }
  0x22   : > { %s2050_s8 = scalar_select %p48_p11, %s1871_s12, %s50_s21  }
  0x23   : > { %p219_p0 = scmp.eq.s32.totalorder %s1448_s18, 3  ;;  %p2057_p2 = por %p213_p9, %p57_p1 }
  0x24   : > { %2796 = sst [smem:[#allocation21_spill]] %s2050_s8  ;;  %p1584_p8 = scmp.lt.s32.totalorder %s1891_s16, 4 }
  0x25   : > { %s2797_s20 = scalar_select %p2057_p2, 1, 0 }
  0x26   : > { %p2061_p4 = por %p219_p0, %p218_p13  ;;  %p2068_p6 = por %p219_p0, %p63_p5 }
  0x27   : > { %2798 = sst [smem:[#allocation22_spill]] %s2797_s20  ;;  %s285_s21 = sand.u32 1, %s1871_s12  }
  0x28   : > { %s2799_s17 = scalar_select %p2061_p4, 1, 0 }
  0x29   : > { %s2800_s22 = scalar_select %p2068_p6, 1, 0 }
  0x2a   : > { %s1451_s24 = sshll.u32 %s285_s21, 8  ;;  %s1452_s26 = sshll.u32 %s1887_s15, 6 }
  0x2b   : > { %s294_s27 = sadd.s32 %s1883_s14, %s1452_s26  ;;  %s289_s18 = scalar_lea.vmem [#allocation6], %s1451_s24 }
  0x2c   : > { %s297_s8 = sshll.u32 %s289_s18, 4  ;;  %s1453_s19 = sshll.u32 %s294_s27, 7  ;;  %s2076_s8 = int_to_ptr.vmem [resolvable:$true] %s297_s8 }
  0x2d   : > { %s2801_s0 = sld [smem:[#allocation44_spill]]  ;;  %p2085_p1 = pnand %p1584_p8, %p2022_p3 }
  0x2e   : > { %s2089_s24 = scalar_lea.sflag [#allocation7], %s285_s21 }
  0x2f   : > { %p1709_p9 = pneg %p2085_p1 }
  0x33   : > { %s2081_s20 = scalar_lea.hbm %s2801_s0, %s1453_s19  ;;  %s1712_s19 = scalar_lea.hbm %s2801_s0, 16384 }
  0x34   : > { %s1707_s26 = scalar_lea.hbm %s2081_s20, 4096  ;;  %p1713_p3 = scmp.lt.u32.totalorder %s2081_s20, %s2801_s0 }
  0x35   : > { %p1708_p5 = scmp.ne.s32.totalorder %s2081_s20, %s1707_s26  ;;  %p1714_p13 = scmp.lt.u32.totalorder %s1712_s19, %s1707_s26 }
  0x36   : > { %p1716_p8 = scmp.lt.u32.totalorder %s1707_s26, %s2081_s20 }
  0x37   : > { %p1710_p10 = pnand %p1709_p9, %p1708_p5  ;;  %p1715_p0 = por %p1714_p13, %p1713_p3 }
  0x39   : > { %p1711_p11 = pneg %p1710_p10  ;;  %p1717_p6 = por %p1716_p8, %p1715_p0 }
  0x3b   : > { %p1718_p4 = pnand %p1717_p6, %p1711_p11 }
  0x3d   : > { %1721 = shalt.err (!%p1718_p4)
}
  0x3e   : > { %s1722_s21 = scalar_lea.vmem %s2076_s8, 4096  ;;  %s1893_s18 = smov [#allocation6]  }
  0x3f   : > { %p1723_p5 = scmp.ne.s32.totalorder %s2076_s8, %s1722_s21  ;;  %s1727_s29 = sshll.u32 %s1893_s18, 4  ;;  %s1728_s29 = int_to_ptr.vmem [resolvable:$false] %s1727_s29 }
  0x40   : > { %s1729_s9 = scalar_lea.vmem %s1728_s29, 8192  ;;  %p1730_p12 = scmp.lt.s32.totalorder %s2076_s8, %s1728_s29 }
  0x41   : > { %p1725_p10 = pnand %p1723_p5, %p1709_p9  ;;  %p1731_p3 = scmp.lt.s32.totalorder %s1729_s9, %s1722_s21 }
  0x43   : > { %p1726_p2 = pneg %p1725_p10  ;;  %p1732_p13 = por %p1731_p3, %p1730_p12 }
  0x45   : > { %p1733_p0 = pnand %p1732_p13, %p1726_p2 }
  0x47   : > { %1736 = shalt.err (!%p1733_p0)
}
  0x48   : > { %s1894_s26 = smov 256   ;;  %s1895_s19 = smov 128  }
  0x49   : > { %s1896_s23 = smov 8   ;;  %p1454_p4 = scmp.ge.s32.totalorder %s1891_s16, 1 }
  0x4a   : > { %1576 = dma.hbm_to_vmem [thread:$0]  (!%p2085_p1), %s2081_s20, 4096, %s2076_s8, %s2089_s24, %s1894_s26, %s1895_s19, %s1896_s23  }
  0x4b   : > { %p305_p6 = scmp.lt.s32.totalorder %s1891_s16, 5 }
  0x4d   : > { %p306_p9 = pnand %p1454_p4, %p305_p6 }
  0x4f   : > { %309 = sbr.rel (%p306_p9) target bundleno = 1151 (0x47f), region = 48 }
  0x56   : > { %s2120_s27 = sand.u32 1, %s1867_s11  }
  0x57   : > { %s1455_s21 = sshll.u32 %s2120_s27, 8  ;;  %s312_s18 = scalar_lea.sflag [#allocation7], %s2120_s27 }
  0x58   : > { %s2124_s29 = scalar_lea.vmem [#allocation6], %s1455_s21 }
  0x59   : > { %1838 = dma.done.wait (%p2034_p7), %s312_s18, 4096  }
  0x5a   : > { %1840 = vsyncadd (%p2034_p7), %s312_s18, 4294963200  ;;  %s2780_s8 = sand.u32 1, %s1855_s30   ;;  %s2783_s20 = scalar_lea.vmem [#allocation10], %s2120_s27 }
  0x5b   : > { %s2133_s12 = scalar_lea.vmem [#allocation9], %s2780_s8  ;;  %p1456_p12 = scmp.ne.s32.totalorder %s1875_s13, 0 }
  0x5c   : > { %vm355_vm0 = vcmask (!%p1456_p12), 0   ;;  %v1897_v0 = vmov (!%p1456_p12), -inf   ;;  %v1898_v1 = vmov (!%p1456_p12), 0.0  }
  0x5d   : > { %354 = sbr.rel (%p1456_p12) target bundleno = 110 (0x6e), region = 56  ;;  %356 = vst.msk [vmem:[#allocation2] sm:$0x1] (!%p1456_p12), %vm355_vm0, %v1897_v0  ;;  %357 = vst.msk [vmem:[#allocation3] sm:$0x1] (!%p1456_p12), %vm355_vm0, %v1898_v1 }
  0x5e   : > { %358 = vst [vmem:[#allocation4] sm:$0xff] (!%p1456_p12), %v1898_v1  ;;  %359 = vst [vmem:[#allocation4 + $0x8] sm:$0xff] (!%p1456_p12), %v1898_v1 }
  0x5f   : > { %360 = vst [vmem:[#allocation4 + $0x10] sm:$0xff] (!%p1456_p12), %v1898_v1  ;;  %361 = vst [vmem:[#allocation4 + $0x18] sm:$0xff] (!%p1456_p12), %v1898_v1 }
  0x60   : > { %362 = vst [vmem:[#allocation4 + $0x20] sm:$0xff] (!%p1456_p12), %v1898_v1  ;;  %363 = vst [vmem:[#allocation4 + $0x28] sm:$0xff] (!%p1456_p12), %v1898_v1 }
  0x61   : > { %364 = vst [vmem:[#allocation4 + $0x30] sm:$0xff] (!%p1456_p12), %v1898_v1  ;;  %365 = vst [vmem:[#allocation4 + $0x38] sm:$0xff] (!%p1456_p12), %v1898_v1 }
  0x62   : > { %366 = vst [vmem:[#allocation4 + $0x40] sm:$0xff] (!%p1456_p12), %v1898_v1  ;;  %367 = vst [vmem:[#allocation4 + $0x48] sm:$0xff] (!%p1456_p12), %v1898_v1 }
  0x63   : > { %368 = vst [vmem:[#allocation4 + $0x50] sm:$0xff] (!%p1456_p12), %v1898_v1  ;;  %369 = vst [vmem:[#allocation4 + $0x58] sm:$0xff] (!%p1456_p12), %v1898_v1 }
  0x64   : > { %370 = vst [vmem:[#allocation4 + $0x60] sm:$0xff] %v1898_v1  ;;  %371 = vst [vmem:[#allocation4 + $0x68] sm:$0xff] %v1898_v1 }
  0x65   : > { %372 = vst [vmem:[#allocation4 + $0x70] sm:$0xff] %v1898_v1  ;;  %373 = vst [vmem:[#allocation4 + $0x78] sm:$0xff] %v1898_v1 }
  0x66   : > { %374 = vst [vmem:[#allocation4 + $0x80] sm:$0xff] %v1898_v1  ;;  %375 = vst [vmem:[#allocation4 + $0x88] sm:$0xff] %v1898_v1 }
  0x67   : > { %376 = vst [vmem:[#allocation4 + $0x90] sm:$0xff] %v1898_v1  ;;  %377 = vst [vmem:[#allocation4 + $0x98] sm:$0xff] %v1898_v1 }
  0x68   : > { %378 = vst [vmem:[#allocation4 + $0xa0] sm:$0xff] %v1898_v1  ;;  %379 = vst [vmem:[#allocation4 + $0xa8] sm:$0xff] %v1898_v1 }
  0x69   : > { %380 = vst [vmem:[#allocation4 + $0xb0] sm:$0xff] %v1898_v1  ;;  %381 = vst [vmem:[#allocation4 + $0xb8] sm:$0xff] %v1898_v1 }
  0x6a   : > { %382 = vst [vmem:[#allocation4 + $0xc0] sm:$0xff] %v1898_v1  ;;  %383 = vst [vmem:[#allocation4 + $0xc8] sm:$0xff] %v1898_v1 }
  0x6b   : > { %384 = vst [vmem:[#allocation4 + $0xd0] sm:$0xff] %v1898_v1  ;;  %385 = vst [vmem:[#allocation4 + $0xd8] sm:$0xff] %v1898_v1 }
  0x6c   : > { %386 = vst [vmem:[#allocation4 + $0xe0] sm:$0xff] %v1898_v1  ;;  %387 = vst [vmem:[#allocation4 + $0xe8] sm:$0xff] %v1898_v1 }
  0x6d   : > { %388 = vst [vmem:[#allocation4 + $0xf0] sm:$0xff] %v1898_v1  ;;  %389 = vst [vmem:[#allocation4 + $0xf8] sm:$0xff] %v1898_v1 }
  0x6e PF: > { %v2138_v2 = vld [vmem:[%s2124_s29 + $0x80] sm:$0xff]  ;;  %v2141_v3 = vld [vmem:[%s2124_s29 + $0x88] sm:$0xff]  ;;  %v2152_v7 = vld [vmem:[%s2124_s29 + $0x90] sm:$0xff]  ;;  %v1899_v9 = vmov 0   ;;  %s2803_s1 = sld [smem:[#allocation45_spill]]  ;;  %s668_s18 = sld [smem:[#allocation5]] }
  0x6f   : > { %v2144_v4 = vld [vmem:[%s2124_s29] sm:$0xff]  ;;  %v1519_v5 = vpack.c.bf16 %v2141_v3, %v2138_v2  ;;  %v2149_v6 = vld [vmem:[%s2124_s29 + $0x8] sm:$0xff]  ;;  %v2155_v8 = vld [vmem:[%s2124_s29 + $0x98] sm:$0xff]  ;;  %1681 = vset.pattern.permute.xlu0 %v1899_v9  ;;  %1682 = vset.pattern.permute.xlu1 %v1899_v9  ;;  %vm865_vm1 = vcmask 0   ;;  %p1457_p7 = scmp.ne.s32.totalorder %s1875_s13, 1 }
  0x70   : > { %v1521_v10 = vpack.c.bf16 %v2149_v6, %v2144_v4  ;;  %v1523_v11 = vpack.c.bf16 %v2155_v8, %v2152_v7  ;;  %v2162_v12 = vld [vmem:[%s2124_s29 + $0x10] sm:$0xff]  ;;  %v2165_v13 = vld [vmem:[%s2124_s29 + $0x18] sm:$0xff]  ;;  %v2168_v14 = vld [vmem:[%s2124_s29 + $0xa0] sm:$0xff]  ;;  %vm1232_vm2 = vcmask (!%p1457_p7), 15360   ;;  %vm1304_vm3 = vcmask (!%p1457_p7), 8192  }
  0x71   : > { %1520 = vmatprep.subr.bf16.mxu0 %v1519_v5  ;;  %1551 = vmatprep.subr.bf16.mxu1 %v1519_v5  ;;  %v2171_v15 = vld [vmem:[%s2124_s29 + $0xa8] sm:$0xff]  ;;  %v1525_v16 = vpack.c.bf16 %v2165_v13, %v2162_v12  ;;  %v2178_v18 = vld [vmem:[%s2124_s29 + $0x20] sm:$0xff]  ;;  %v2184_v20 = vld [vmem:[%s2124_s29 + $0xb0] sm:$0xff] }
  0x72   : > { %1522 = vmatpush3.bf16.msra.mxu0 %v1521_v10  ;;  %1559 = vmatpush3.bf16.msra.mxu1 %v1521_v10  ;;  %v1527_v17 = vpack.c.bf16 %v2171_v15, %v2168_v14  ;;  %v2181_v19 = vld [vmem:[%s2124_s29 + $0x28] sm:$0xff]  ;;  %v2187_v21 = vld [vmem:[%s2124_s29 + $0xb8] sm:$0xff]  ;;  %v2194_v24 = vld [vmem:[%s2124_s29 + $0x30] sm:$0xff] }
  0x73   : > { %1524 = vmatprep.subr.bf16.mxu0 %v1523_v11  ;;  %1552 = vmatprep.subr.bf16.mxu1 %v1523_v11  ;;  %v1529_v22 = vpack.c.bf16 %v2181_v19, %v2178_v18  ;;  %v1531_v23 = vpack.c.bf16 %v2187_v21, %v2184_v20  ;;  %v2197_v25 = vld [vmem:[%s2124_s29 + $0x38] sm:$0xff]  ;;  %v2200_v26 = vld [vmem:[%s2124_s29 + $0xc0] sm:$0xff]  ;;  %v2203_v27 = vld [vmem:[%s2124_s29 + $0xc8] sm:$0xff] }
  0x74   : > { %v423_v28 = vld [vmem:[%s2803_s1 + $0x8] sm:$0xff]  ;;  %v1533_v30 = vpack.c.bf16 %v2197_v25, %v2194_v24  ;;  %v1535_v31 = vpack.c.bf16 %v2203_v27, %v2200_v26  ;;  %v2222_v34 = vld [vmem:[%s2124_s29 + $0xd0] sm:$0xff]  ;;  %v2225_v35 = vld [vmem:[%s2124_s29 + $0xd8] sm:$0xff] }
  0x75   : > { %550 = vmatprep.mubr.f32.mxu0 %v423_v28  ;;  %v431_v29 = vld [vmem:[%s2803_s1 + $0x48] sm:$0xff]  ;;  %v438_v37 = vld [vmem:[%s2763_s2] sm:$0xff]  ;;  %v440_v38 = vld [vmem:[%s2763_s2 + $0x10] sm:$0xff]  ;;  %v1539_v39 = vpack.c.bf16 %v2225_v35, %v2222_v34 }
  0x76   : > { %1526 = vmatpush3.bf16.msra.mxu0 %v1525_v16  ;;  %1560 = vmatpush3.bf16.msra.mxu1 %v1525_v16  ;;  %v2216_v32 = vld [vmem:[%s2124_s29 + $0x40] sm:$0xff]  ;;  %v2219_v33 = vld [vmem:[%s2124_s29 + $0x48] sm:$0xff]  ;;  %v2238_v40 = vld [vmem:[%s2124_s29 + $0x50] sm:$0xff] }
  0x77   : > { %1528 = vmatprep.subr.bf16.mxu0 %v1527_v17  ;;  %1553 = vmatprep.subr.bf16.mxu1 %v1527_v17  ;;  %v1537_v36 = vpack.c.bf16 %v2219_v33, %v2216_v32  ;;  %v2241_v41 = vld [vmem:[%s2124_s29 + $0x58] sm:$0xff]  ;;  %v2244_v42 = vld [vmem:[%s2124_s29 + $0xe0] sm:$0xff]  ;;  %v2247_v43 = vld [vmem:[%s2124_s29 + $0xe8] sm:$0xff] }
  0x78   : > { %570 = vmatprep.mubr.f32.mxu1 %v431_v29  ;;  %448 = vperm.xlu0 %1681, %v438_v37   ;;  %v439_v44 = vld [vmem:[%s2763_s2 + $0x8] sm:$0xff]  ;;  %v441_v45 = vld [vmem:[%s2763_s2 + $0x18] sm:$0xff]  ;;  %v1541_v46 = vpack.c.bf16 %v2241_v41, %v2238_v40  ;;  %v1543_v47 = vpack.c.bf16 %v2247_v43, %v2244_v42  ;;  %v442_v52 = vld [vmem:[%s2763_s2 + $0x20] sm:$0xff] }
  0x79   : > { %458 = vperm.xlu1 %1682, %v440_v38   ;;  %v2260_v48 = vld [vmem:[%s2124_s29 + $0x60] sm:$0xff]  ;;  %v2263_v49 = vld [vmem:[%s2124_s29 + $0x68] sm:$0xff]  ;;  %v2266_v50 = vld [vmem:[%s2124_s29 + $0xf0] sm:$0xff] }
  0x7a   : > { %1530 = vmatpush3.bf16.msra.mxu0 %v1529_v22  ;;  %1561 = vmatpush3.bf16.msra.mxu1 %v1529_v22  ;;  %v2269_v51 = vld [vmem:[%s2124_s29 + $0xf8] sm:$0xff]  ;;  %v443_v53 = vld [vmem:[%s2763_s2 + $0x28] sm:$0xff]  ;;  %v1545_v54 = vpack.c.bf16 %v2263_v49, %v2260_v48  ;;  %v2282_v56 = vld [vmem:[%s2124_s29 + $0x70] sm:$0xff] }
  0x7b   : > { %1532 = vmatprep.subr.bf16.mxu0 %v1531_v23  ;;  %1554 = vmatprep.subr.bf16.mxu1 %v1531_v23  ;;  %v1547_v55 = vpack.c.bf16 %v2269_v51, %v2266_v50  ;;  %v2285_v57 = vld [vmem:[%s2124_s29 + $0x78] sm:$0xff]  ;;  %v444_v58 = vld [vmem:[%s2763_s2 + $0x30] sm:$0xff]  ;;  %v600_v62 = vld [vmem:[%s2764_s3 + $0x8] sm:$0xff] }
  0x7c   : > { %453 = vperm.xlu0 %1681, %v439_v44   ;;  %v445_v59 = vld [vmem:[%s2763_s2 + $0x38] sm:$0xff]  ;;  %v1549_v60 = vpack.c.bf16 %v2285_v57, %v2282_v56  ;;  %v599_v61 = vld [vmem:[%s2764_s3] sm:$0xff]  ;;  %v601_v9 = vld [vmem:[%s2764_s3 + $0x10] sm:$0xff] }
  0x7d   : > { %463 = vperm.xlu1 %1682, %v441_v45   ;;  %v422_v63 = vld [vmem:[%s2803_s1] sm:$0xff]  ;;  %v425_v1 = vld [vmem:[%s2803_s1 + $0x18] sm:$0xff]  ;;  %v424_v11 = vld [vmem:[%s2803_s1 + $0x10] sm:$0xff] }
  0x7e   : > { %1534 = vmatpush3.bf16.msra.mxu0 %v1533_v30  ;;  %1562 = vmatpush3.bf16.msra.mxu1 %v1533_v30  ;;  %v430_v0 = vld [vmem:[%s2803_s1 + $0x40] sm:$0xff]  ;;  %v433_v5 = vld [vmem:[%s2803_s1 + $0x58] sm:$0xff]  ;;  %v432_v16 = vld [vmem:[%s2803_s1 + $0x50] sm:$0xff] }
  0x7f   : > { %1536 = vmatprep.subr.bf16.mxu0 %v1535_v31  ;;  %1555 = vmatprep.subr.bf16.mxu1 %v1535_v31  ;;  %v602_v10 = vld [vmem:[%s2764_s3 + $0x18] sm:$0xff]  ;;  %v427_v17 = vld [vmem:[%s2803_s1 + $0x28] sm:$0xff]  ;;  %v603_v23 = vld [vmem:[%s2764_s3 + $0x20] sm:$0xff] }
  0x80   : > { %468 = vperm.xlu0 %1681, %v442_v52   ;;  %v435_v22 = vld [vmem:[%s2803_s1 + $0x68] sm:$0xff]  ;;  %v426_v29 = vld [vmem:[%s2803_s1 + $0x20] sm:$0xff]  ;;  %v429_v31 = vld [vmem:[%s2803_s1 + $0x38] sm:$0xff] }
  0x81   : > { %473 = vperm.xlu1 %1682, %v443_v53   ;;  %v604_v28 = vld [vmem:[%s2764_s3 + $0x28] sm:$0xff]  ;;  %v434_v30 = vld [vmem:[%s2803_s1 + $0x60] sm:$0xff]  ;;  %v605_v37 = vld [vmem:[%s2764_s3 + $0x30] sm:$0xff] }
  0x82   : > { %1538 = vmatpush3.bf16.msra.mxu0 %v1537_v36  ;;  %1563 = vmatpush3.bf16.msra.mxu1 %v1537_v36  ;;  %v437_v36 = vld [vmem:[%s2803_s1 + $0x78] sm:$0xff]  ;;  %v436_v44 = vld [vmem:[%s2803_s1 + $0x70] sm:$0xff] }
  0x83   : > { %1540 = vmatprep.subr.bf16.mxu0 %v1539_v39  ;;  %1556 = vmatprep.subr.bf16.mxu1 %v1539_v39  ;;  %v606_v38 = vld [vmem:[%s2764_s3 + $0x38] sm:$0xff]  ;;  %v428_v39 = vld [vmem:[%s2803_s1 + $0x30] sm:$0xff] }
  0x84   : > { %478 = vperm.xlu0 %1681, %v444_v58  }
  0x85   : > { %483 = vperm.xlu1 %1682, %v445_v59  }
  0x86   : > { %1542 = vmatpush3.bf16.msra.mxu0 %v1541_v46  ;;  %1564 = vmatpush3.bf16.msra.mxu1 %v1541_v46 }
  0x87   : > { %1544 = vmatprep.subr.bf16.mxu0 %v1543_v47  ;;  %1557 = vmatprep.subr.bf16.mxu1 %v1543_v47 }
  0x88   : > { %609 = vperm.xlu0 %1681, %v599_v61  }
  0x89   : > { %614 = vperm.xlu1 %1682, %v600_v62  }
  0x8a   : > { %1546 = vmatpush3.bf16.msra.mxu0 %v1545_v54  ;;  %1565 = vmatpush3.bf16.msra.mxu1 %v1545_v54 }
  0x8b   : > { %1548 = vmatprep.subr.bf16.mxu0 %v1547_v55  ;;  %1558 = vmatprep.subr.bf16.mxu1 %v1547_v55 }
  0x8c   : > { %619 = vperm.xlu0 %1681, %v601_v9  }
  0x8d   : > { %624 = vperm.xlu1 %1682, %v602_v10  }
  0x8e   : > { %1550 = vmatpush3.bf16.msra.mxu0 %v1549_v60  ;;  %1566 = vmatpush3.bf16.msra.mxu1 %v1549_v60 }
  0x90   : > { %629 = vperm.xlu0 %1681, %v603_v23  }
  0x91   : > { %551 = vmatmul.mubr.f32.vlgmr.msra.gmra.mrb[0].mxu0 %v422_v63  ;;  %571 = vmatmul.mubr.f32.vlgmr.msra.gmra.mrb[0].mxu1 %v430_v0 }
  0x92   : > { %555 = vmatprep.mubr.f32.mxu0 %v425_v1  ;;  %575 = vmatprep.mubr.f32.mxu1 %v433_v5 }
  0x93   : > { %634 = vperm.xlu1 %1682, %v604_v28  }
  0x94   : > { %639 = vperm.xlu0 %1681, %v605_v37  }
  0x95   : > { %556 = vmatmul.mubr.f32.gmra.mrb[2].mxu0 %v424_v11  ;;  %576 = vmatmul.mubr.f32.gmra.mrb[2].mxu1 %v432_v16 }
  0x96   : > { %560 = vmatprep.mubr.f32.mxu0 %v427_v17  ;;  %580 = vmatprep.mubr.f32.mxu1 %v435_v22 }
  0x97   : > { %644 = vperm.xlu1 %1682, %v606_v38  }
  0x99   : > { %561 = vmatmul.mubr.f32.gmra.mrb[4].mxu0 %v426_v29  ;;  %581 = vmatmul.mubr.f32.gmra.mrb[4].mxu1 %v434_v30 }
  0x9a   : > { %565 = vmatprep.mubr.f32.mxu0 %v429_v31  ;;  %585 = vmatprep.mubr.f32.mxu1 %v437_v36 }
  0x9d   : > { %566 = vmatmul.mubr.f32.gmra.mrb[6].mxu0 %v428_v39  ;;  %586 = vmatmul.mubr.f32.gmra.mrb[6].mxu1 %v436_v44 }
  0xf7   : > { %v449_v45 = vpop.permute.xlu0 %448 }
  0xf8   : > { %v459_v46 = vpop.permute.xlu1 %458 }
  0xfb   : > { %v454_v47 = vpop.permute.xlu0 %453 }
  0xfc   : > { %v464_v52 = vpop.permute.xlu1 %463 }
  0xff   : > { %v469_v61 = vpop.permute.xlu0 %468 }
 0x100   : > { %v474_v62 = vpop.permute.xlu1 %473 }
 0x103   : > { %v479_v29 = vpop.permute.xlu0 %478 }
 0x104   : > { %v484_v36 = vpop.permute.xlu1 %483 }
 0x164   : > { %v1495_v53 = vpop.f32.mrb[0].mxu0  ;;  %v1507_v54 = vpop.f32.mrb[0].mxu1 }
 0x165   : > { %v1496_v55 = vpop.f32.mrb[1].mxu0  ;;  %v1508_v58 = vpop.f32.mrb[1].mxu1 }
 0x166   : > { %v1497_v59 = vadd.f32 %v1496_v55, %v1495_v53  ;;  %v1509_v60 = vadd.f32 %v1508_v58, %v1507_v54  ;;  %v610_v58 = vpop.permute.xlu0 %609 }
 0x168   : > { %v553_v63 = vadd.f32 %v1497_v59, %v449_v45  ;;  %v1498_v0 = vpop.f32.mrb[2].mxu0  ;;  %v1510_v1 = vpop.f32.mrb[2].mxu1  ;;  %v573_v44 = vadd.f32 %v1509_v60, %v469_v61 }
 0x169   : > { %v1499_v5 = vpop.f32.mrb[3].mxu0  ;;  %v1511_v9 = vpop.f32.mrb[3].mxu1 }
 0x16a   : > { %v1500_v10 = vadd.f32 %v1499_v5, %v1498_v0  ;;  %v1512_v11 = vadd.f32 %v1511_v9, %v1510_v1  ;;  %1683 = vtanh.f32 %v553_v63  ;;  %v615_v0 = vpop.permute.xlu1 %614 }
 0x16c   : > { %v558_v16 = vadd.f32 %v1500_v10, %v454_v47  ;;  %v1501_v17 = vpop.f32.mrb[4].mxu0  ;;  %v1513_v22 = vpop.f32.mrb[4].mxu1  ;;  %v578_v47 = vadd.f32 %v1512_v11, %v474_v62 }
 0x16d   : > { %v1502_v23 = vpop.f32.mrb[5].mxu0  ;;  %v1514_v28 = vpop.f32.mrb[5].mxu1 }
 0x16e   : > { %1685 = vtanh.f32 %v558_v16  ;;  %v1503_v30 = vadd.f32 %v1502_v23, %v1501_v17  ;;  %v1515_v31 = vadd.f32 %v1514_v28, %v1513_v22  ;;  %v620_v16 = vpop.permute.xlu0 %619  ;;  %v625_v17 = vpop.permute.xlu1 %624 }
 0x170   : > { %v563_v37 = vadd.f32 %v1503_v30, %v459_v46  ;;  %v1504_v38 = vpop.f32.mrb[6].mxu0  ;;  %v1516_v39 = vpop.f32.mrb[6].mxu1  ;;  %v583_v1 = vadd.f32 %v1515_v31, %v479_v29 }
 0x171   : > { %v1505_v45 = vpop.f32.mrb[7].mxu0  ;;  %v1517_v53 = vpop.f32.mrb[7].mxu1 }
 0x172   : > { %1687 = vtanh.f32 %v563_v37  ;;  %v1506_v54 = vadd.f32 %v1505_v45, %v1504_v38  ;;  %v1518_v55 = vadd.f32 %v1517_v53, %v1516_v39  ;;  %v630_v11 = vpop.permute.xlu0 %629  ;;  %v635_v29 = vpop.permute.xlu1 %634 }
 0x173   : > { %1689 = vtanh.f32 %v573_v44 }
 0x174   : > { %v568_v59 = vadd.f32 %v1506_v54, %v464_v52  ;;  %v1684_v63 = vpop.eup %1683  ;;  %v588_v9 = vadd.f32 %v1518_v55, %v484_v36 }
 0x175   : > { %v647_v46 = vmul.f32 %v1684_v63, %v610_v58 }
 0x176   : > { %1691 = vtanh.f32 %v568_v59  ;;  %v640_v45 = vpop.permute.xlu0 %639  ;;  %v645_v55 = vpop.permute.xlu1 %644 }
 0x177   : > { %1693 = vtanh.f32 %v578_v47 }
 0x178   : > { %v1686_v5 = vpop.eup %1685  ;;  %1695 = vtanh.f32 %v583_v1 }
 0x179   : > { %v648_v10 = vmul.f32 %v1686_v5, %v615_v0  ;;  %1697 = vtanh.f32 %v588_v9 }
 0x17b   : > { %v655_v60 = vadd.f32 %v648_v10, %v647_v46  ;;  %v669_v46 = vstv %s668_s18 }
 0x17c   : > { %v1688_v61 = vpop.eup %1687 }
 0x17d   : > { %v649_v22 = vmul.f32 %v1688_v61, %v620_v16  ;;  %v1690_v23 = vpop.eup %1689 }
 0x17e   : > { %v651_v31 = vmul.f32 %v1690_v23, %v630_v11 }
 0x17f   : > { %v656_v62 = vadd.f32 %v655_v60, %v649_v22  ;;  %v672_v60 = vld [vmem:[#allocation2] sm:$0x1] }
 0x180   : > { %v1692_v52 = vpop.eup %1691 }
 0x181   : > { %v650_v28 = vmul.f32 %v1692_v52, %v625_v17  ;;  %v1694_v30 = vpop.eup %1693 }
 0x182   : > { %v1696_v38 = vpop.eup %1695  ;;  %v652_v36 = vmul.f32 %v1694_v30, %v635_v29 }
 0x183   : > { %v657_v37 = vadd.f32 %v656_v62, %v650_v28  ;;  %v1698_v44 = vpop.eup %1697  ;;  %v653_v53 = vmul.f32 %v1696_v38, %v640_v45  ;;  %v684_v62 = vlaneseq }
 0x184   : > { %v654_v58 = vmul.f32 %v1698_v44, %v645_v55 }
 0x185   : > { %v658_v39 = vadd.f32 %v657_v37, %v651_v31  ;;  %v685_v52 = vshrl.u32 %v684_v62, 7  ;;  %v739_v62 = vld [vmem:[#allocation4 + $0x80] sm:$0xff] }
 0x187   : > { %v659_v54 = vadd.f32 %v658_v39, %v652_v36  ;;  %v2364_v11 = vsub.s32 0, %v685_v52  ;;  %v741_v52 = vld [vmem:[#allocation4 + $0x90] sm:$0xff] }
 0x189   : > { %v660_v47 = vadd.f32 %v659_v54, %v653_v53  ;;  %2804 = vst [vmem:[#allocation23_spill] sm:$0xff] %v2364_v11 }
 0x18b   : > { %v661_v59 = vadd.f32 %v660_v47, %v654_v58  ;;  %v724_v47 = vld [vmem:[#allocation4 + $0x8] sm:$0xff] }
 0x18d   : > { %v662_v63 = vrot.slane %v661_v59, 4 }
 0x18f   : > { %v663_v0 = vadd.f32 %v662_v63, %v661_v59  ;;  %v725_v59 = vld [vmem:[#allocation4 + $0x10] sm:$0xff] }
 0x191   : > { %v664_v1 = vrot.slane %v663_v0, 2 }
 0x193   : > { %v665_v5 = vadd.f32 %v664_v1, %v663_v0  ;;  %v728_v0 = vld [vmem:[#allocation4 + $0x28] sm:$0xff]  ;;  %v730_v1 = vld [vmem:[#allocation4 + $0x38] sm:$0xff] }
 0x195   : > { %v666_v9 = vrot.slane %v665_v5, 1 }
 0x197   : > { %v667_v10 = vadd.f32 %v666_v9, %v665_v5 }
 0x199   : > { %v670_v16 = vadd.f32 %v669_v46, %v667_v10  ;;  %v732_v46 = vld [vmem:[#allocation4 + $0x48] sm:$0xff] }
 0x19b   : > { %673 = vmax.xlane.f32.xlu0 %v670_v16  ;;  %671 = vst [vmem:[%s2783_s20] sm:$0x1] %v670_v16 }
 0x228   : > { %v674_v61 = vpop.xlane.xlu0 %673 }
 0x229   : > { %v675_v17 = vmax.f32 %v672_v60, %v674_v61  ;;  %v735_v61 = vld [vmem:[#allocation4 + $0x60] sm:$0xff] }
 0x22b   : > { %v676_v22 = vsub.f32 %v672_v60, %v675_v17  ;;  %867 = vst.msk [vmem:[#allocation2] sm:$0x1] %vm865_vm1, %v675_v17  ;;  %681 = vperm.xlu1 %1682, %v675_v17  }
 0x22d   : > { %v677_v23 = vmul.f32 1.442695, %v676_v22 }
 0x22f   : > { %1699 = vpow2.f32 %v677_v23  ;;  %v738_v23 = vld [vmem:[#allocation4 + $0x78] sm:$0xff] }
 0x239   : > { %v2366_v28 = vpop.eup %1699 }
 0x23a   : > { %2805 = vst [vmem:[#allocation24_spill] sm:$0xff] %v2366_v28  ;;  %v759_v30 = vrot.slane %v2366_v28, %v2364_v11 }
 0x23c   : > { %761 = vperm.xlu0 %1681, %v759_v30   ;;  %v742_v30 = vld [vmem:[#allocation4 + $0x98] sm:$0xff] }
 0x2aa   : > { %v682_v29 = vpop.permute.xlu1 %681 }
 0x2ab   : > { %v687_v31 = vrot.slane %v682_v29, %v2364_v11  ;;  %v744_v11 = vld [vmem:[#allocation4 + $0xa8] sm:$0xff] }
 0x2ad   : > { %v688_v37 = vsub.f32 %v670_v16, %v687_v31 }
 0x2af   : > { %v689_v38 = vmul.f32 1.442695, %v688_v37 }
 0x2b1   : > { %1701 = vpow2.f32 %v689_v38  ;;  %v743_v38 = vld [vmem:[#allocation4 + $0xa0] sm:$0xff] }
 0x2bb   : > { %v1702_v36 = vpop.eup %1701  ;;  %v762_v10 = vpop.permute.xlu0 %761 }
 0x2bc   : > { %v2372_v39 = vmul.f32 %v1702_v36, %v2144_v4  ;;  %v2375_v44 = vmul.f32 %v1702_v36, %v2149_v6  ;;  %v2378_v45 = vmul.f32 %v1702_v36, %v2162_v12  ;;  %v2381_v53 = vmul.f32 %v1702_v36, %v2165_v13  ;;  %862 = vadd.xlane.f32.xlu1 %v1702_v36 }
 0x2bd   : > { %v2384_v54 = vmul.f32 %v1702_v36, %v2178_v18  ;;  %v2387_v55 = vmul.f32 %v1702_v36, %v2181_v19  ;;  %v2390_v58 = vmul.f32 %v1702_v36, %v2194_v24  ;;  %v2393_v4 = vmul.f32 %v1702_v36, %v2197_v25 }
 0x2be   : > { %v2396_v6 = vmul.f32 %v1702_v36, %v2216_v32  ;;  %v2399_v12 = vmul.f32 %v1702_v36, %v2219_v33  ;;  %v2402_v13 = vmul.f32 %v1702_v36, %v2238_v40  ;;  %v2405_v18 = vmul.f32 %v1702_v36, %v2241_v41  ;;  %v723_v33 = vld [vmem:[#allocation4] sm:$0xff]  ;;  %v726_v40 = vld [vmem:[#allocation4 + $0x18] sm:$0xff] }
 0x2bf   : > { %v2408_v19 = vmul.f32 %v1702_v36, %v2260_v48  ;;  %v2411_v24 = vmul.f32 %v1702_v36, %v2263_v49  ;;  %v2414_v25 = vmul.f32 %v1702_v36, %v2282_v56  ;;  %v2417_v32 = vmul.f32 %v1702_v36, %v2285_v57  ;;  %v727_v56 = vld [vmem:[#allocation4 + $0x20] sm:$0xff]  ;;  %v729_v57 = vld [vmem:[#allocation4 + $0x30] sm:$0xff] }
 0x2c0   : > { %v2420_v63 = vmul.f32 %v1702_v36, %v2138_v2  ;;  %v2423_v41 = vmul.f32 %v1702_v36, %v2141_v3  ;;  %v2426_v48 = vmul.f32 %v1702_v36, %v2152_v7  ;;  %v2429_v49 = vmul.f32 %v1702_v36, %v2155_v8  ;;  %v731_v7 = vld [vmem:[#allocation4 + $0x40] sm:$0xff]  ;;  %v733_v8 = vld [vmem:[#allocation4 + $0x50] sm:$0xff] }
 0x2c1   : > { %2806 = vst [vmem:[#allocation25_spill] sm:$0xff] %v2411_v24  ;;  %2807 = vst [vmem:[#allocation26_spill] sm:$0xff] %v2414_v25  ;;  %v2432_v5 = vmul.f32 %v1702_v36, %v2168_v14  ;;  %v2435_v9 = vmul.f32 %v1702_v36, %v2171_v15  ;;  %v2438_v2 = vmul.f32 %v1702_v36, %v2184_v20  ;;  %v734_v20 = vld [vmem:[#allocation4 + $0x58] sm:$0xff] }
 0x2c2   : > { %2808 = vst [vmem:[#allocation27_spill] sm:$0xff] %v2417_v32  ;;  %2809 = vst [vmem:[#allocation28_spill] sm:$0xff] %v2420_v63  ;;  %v2441_v3 = vmul.f32 %v1702_v36, %v2187_v21  ;;  %v2444_v16 = vmul.f32 %v1702_v36, %v2200_v26  ;;  %v2447_v60 = vmul.f32 %v1702_v36, %v2203_v27  ;;  %v736_v21 = vld [vmem:[#allocation4 + $0x68] sm:$0xff] }
 0x2c3   : > { %2810 = vst [vmem:[#allocation29_spill] sm:$0xff] %v2423_v41  ;;  %2811 = vst [vmem:[#allocation30_spill] sm:$0xff] %v2426_v48  ;;  %v2450_v14 = vmul.f32 %v1702_v36, %v2222_v34  ;;  %v2453_v15 = vmul.f32 %v1702_v36, %v2225_v35  ;;  %v2456_v17 = vmul.f32 %v1702_v36, %v2244_v42  ;;  %v737_v34 = vld [vmem:[#allocation4 + $0x70] sm:$0xff]  ;;  %v740_v35 = vld [vmem:[#allocation4 + $0x88] sm:$0xff] }
 0x2c4   : > { %2812 = vst [vmem:[#allocation31_spill] sm:$0xff] %v2429_v49  ;;  %2813 = vst [vmem:[#allocation32_spill] sm:$0xff] %v2432_v5  ;;  %v2459_v22 = vmul.f32 %v1702_v36, %v2247_v43  ;;  %v2462_v26 = vmul.f32 %v1702_v36, %v2266_v50  ;;  %v2465_v27 = vmul.f32 %v1702_v36, %v2269_v51  ;;  %v745_v43 = vld [vmem:[#allocation4 + $0xb0] sm:$0xff]  ;;  %v747_v51 = vld [vmem:[#allocation4 + $0xc0] sm:$0xff] }
 0x2c5   : > { %2814 = vst [vmem:[#allocation33_spill] sm:$0xff] %v2435_v9  ;;  %2815 = vst [vmem:[#allocation34_spill] sm:$0xff] %v2438_v2  ;;  %v764_v29 = vmul.f32 %v762_v10, %v723_v33  ;;  %v765_v31 = vmul.f32 %v762_v10, %v724_v47  ;;  %v766_v37 = vmul.f32 %v762_v10, %v725_v59  ;;  %v748_v36 = vld [vmem:[#allocation4 + $0xc8] sm:$0xff]  ;;  %v751_v33 = vld [vmem:[#allocation4 + $0xe0] sm:$0xff] }
 0x2c6   : > { %2816 = vst [vmem:[#allocation35_spill] sm:$0xff] %v2441_v3  ;;  %2817 = vst [vmem:[#allocation36_spill] sm:$0xff] %v2444_v16  ;;  %v767_v42 = vmul.f32 %v762_v10, %v726_v40  ;;  %v768_v28 = vmul.f32 %v762_v10, %v727_v56  ;;  %v770_v50 = vmul.f32 %v762_v10, %v729_v57  ;;  %v749_v16 = vld [vmem:[#allocation4 + $0xd0] sm:$0xff]  ;;  %v750_v3 = vld [vmem:[#allocation4 + $0xd8] sm:$0xff] }
 0x2c7   : > { %2818 = vst [vmem:[#allocation37_spill] sm:$0xff] %v2447_v60  ;;  %2819 = vst [vmem:[#allocation38_spill] sm:$0xff] %v2450_v14  ;;  %v774_v14 = vmul.f32 %v762_v10, %v733_v8  ;;  %v775_v60 = vmul.f32 %v762_v10, %v734_v20  ;;  %v776_v47 = vmul.f32 %v762_v10, %v735_v61  ;;  %v752_v9 = vld [vmem:[#allocation4 + $0xe8] sm:$0xff]  ;;  %v753_v5 = vld [vmem:[#allocation4 + $0xf0] sm:$0xff] }
 0x2c8   : > { %2820 = vst [vmem:[#allocation39_spill] sm:$0xff] %v2453_v15  ;;  %2821 = vst [vmem:[#allocation40_spill] sm:$0xff] %v2456_v17  ;;  %v746_v17 = vld [vmem:[#allocation4 + $0xb8] sm:$0xff]  ;;  %v773_v15 = vmul.f32 %v762_v10, %v732_v46  ;;  %v777_v59 = vmul.f32 %v762_v10, %v736_v21  ;;  %v778_v40 = vmul.f32 %v762_v10, %v737_v34 }
 0x2c9   : > { %2822 = vst [vmem:[#allocation41_spill] sm:$0xff] %v2459_v22  ;;  %2823 = vst [vmem:[#allocation42_spill] sm:$0xff] %v2462_v26  ;;  %v769_v22 = vmul.f32 %v762_v10, %v728_v0  ;;  %v771_v26 = vmul.f32 %v762_v10, %v730_v1  ;;  %v779_v2 = vmul.f32 %v762_v10, %v738_v23  ;;  %v754_v56 = vld [vmem:[#allocation4 + $0xf8] sm:$0xff] }
 0x2ca   : > { %2824 = vst [vmem:[#allocation43_spill] sm:$0xff] %v2465_v27  ;;  %v772_v27 = vmul.f32 %v762_v10, %v731_v7  ;;  %v780_v0 = vmul.f32 %v762_v10, %v739_v62  ;;  %v781_v57 = vmul.f32 %v762_v10, %v740_v35  ;;  %v782_v1 = vmul.f32 %v762_v10, %v741_v52 }
 0x2cb   : > { %v783_v49 = vmul.f32 %v762_v10, %v742_v30  ;;  %v784_v48 = vmul.f32 %v762_v10, %v743_v38  ;;  %v785_v41 = vmul.f32 %v762_v10, %v744_v11  ;;  %v786_v7 = vmul.f32 %v762_v10, %v745_v43 }
 0x2cc   : > { %v787_v46 = vmul.f32 %v762_v10, %v746_v17  ;;  %v788_v8 = vmul.f32 %v762_v10, %v747_v51  ;;  %v789_v20 = vmul.f32 %v762_v10, %v748_v36  ;;  %v790_v63 = vmul.f32 %v762_v10, %v749_v16  ;;  %v2831_v16 = vld [vmem:[#allocation31_spill] sm:$0xff] }
 0x2cd   : > { %v791_v32 = vmul.f32 %v762_v10, %v750_v3  ;;  %v792_v25 = vmul.f32 %v762_v10, %v751_v33  ;;  %v793_v61 = vmul.f32 %v762_v10, %v752_v9  ;;  %v794_v21 = vmul.f32 %v762_v10, %v753_v5 }
 0x2ce   : > { %v795_v34 = vmul.f32 %v762_v10, %v754_v56  ;;  %v796_v23 = vadd.f32 %v764_v29, %v2372_v39  ;;  %v797_v24 = vadd.f32 %v765_v31, %v2375_v44  ;;  %v798_v62 = vadd.f32 %v766_v37, %v2378_v45  ;;  %v2825_v45 = vld [vmem:[#allocation25_spill] sm:$0xff]  ;;  %v2830_v10 = vld [vmem:[#allocation30_spill] sm:$0xff]  ;;  %v2836_v29 = vld [vmem:[#allocation36_spill] sm:$0xff] }
 0x2cf   : > { %v799_v35 = vadd.f32 %v767_v42, %v2381_v53  ;;  %v800_v11 = vadd.f32 %v768_v28, %v2384_v54  ;;  %v801_v17 = vadd.f32 %v769_v22, %v2387_v55  ;;  %v802_v52 = vadd.f32 %v770_v50, %v2390_v58  ;;  %v2826_v54 = vld [vmem:[#allocation26_spill] sm:$0xff]  ;;  %v2827_v58 = vld [vmem:[#allocation27_spill] sm:$0xff]  ;;  %v2837_v37 = vld [vmem:[#allocation37_spill] sm:$0xff] }
 0x2d0   : > { %v803_v3 = vadd.f32 %v771_v26, %v2393_v4  ;;  %v804_v9 = vadd.f32 %v772_v27, %v2396_v6  ;;  %v805_v5 = vadd.f32 %v773_v15, %v2399_v12  ;;  %v806_v39 = vadd.f32 %v774_v14, %v2402_v13  ;;  %828 = vst [vmem:[#allocation4] sm:$0xff] %v796_v23  ;;  %v2828_v6 = vld [vmem:[#allocation28_spill] sm:$0xff]  ;;  %v2829_v13 = vld [vmem:[#allocation29_spill] sm:$0xff]  ;;  %v2834_v22 = vld [vmem:[#allocation34_spill] sm:$0xff] }
 0x2d1   : > { %v807_v44 = vadd.f32 %v775_v60, %v2405_v18  ;;  %829 = vst [vmem:[#allocation4 + $0x8] sm:$0xff] %v797_v24  ;;  %830 = vst [vmem:[#allocation4 + $0x10] sm:$0xff] %v798_v62  ;;  %v808_v28 = vadd.f32 %v776_v47, %v2408_v19  ;;  %v809_v53 = vadd.f32 %v777_v59, %v2825_v45  ;;  %v2832_v19 = vld [vmem:[#allocation32_spill] sm:$0xff]  ;;  %v2833_v15 = vld [vmem:[#allocation33_spill] sm:$0xff]  ;;  %v1900_v62 = vmov (!%p1457_p7), 0  }
 0x2d2   : > { %831 = vst [vmem:[#allocation4 + $0x18] sm:$0xff] %v799_v35  ;;  %v810_v55 = vadd.f32 %v778_v40, %v2826_v54  ;;  %v811_v4 = vadd.f32 %v779_v2, %v2827_v58  ;;  %832 = vst [vmem:[#allocation4 + $0x20] sm:$0xff] %v800_v11  ;;  %v812_v12 = vadd.f32 %v780_v0, %v2828_v6  ;;  %v2835_v27 = vld [vmem:[#allocation35_spill] sm:$0xff]  ;;  %v2838_v42 = vld [vmem:[#allocation38_spill] sm:$0xff]  ;;  %1703 = vset.pattern.permute.xlu0 (!%p1457_p7), %v1900_v62 }
 0x2d3   : > { %833 = vst [vmem:[#allocation4 + $0x28] sm:$0xff] %v801_v17  ;;  %834 = vst [vmem:[#allocation4 + $0x30] sm:$0xff] %v802_v52  ;;  %v813_v18 = vadd.f32 %v781_v57, %v2829_v13  ;;  %v814_v24 = vadd.f32 %v782_v1, %v2830_v10  ;;  %v815_v60 = vadd.f32 %v783_v49, %v2831_v16  ;;  %v2839_v43 = vld [vmem:[#allocation39_spill] sm:$0xff]  ;;  %v2841_v51 = vld [vmem:[#allocation41_spill] sm:$0xff]  ;;  %1704 = vset.pattern.permute.xlu1 (!%p1457_p7), %v1900_v62 }
 0x2d4   : > { %835 = vst [vmem:[#allocation4 + $0x38] sm:$0xff] %v803_v3  ;;  %836 = vst [vmem:[#allocation4 + $0x40] sm:$0xff] %v804_v9  ;;  %v816_v14 = vadd.f32 %v784_v48, %v2832_v19  ;;  %v817_v2 = vadd.f32 %v785_v41, %v2833_v15  ;;  %v818_v26 = vadd.f32 %v786_v7, %v2834_v22  ;;  %v2840_v41 = vld [vmem:[#allocation40_spill] sm:$0xff]  ;;  %v2842_v33 = vld [vmem:[#allocation42_spill] sm:$0xff] }
 0x2d5   : > { %837 = vst [vmem:[#allocation4 + $0x48] sm:$0xff] %v805_v5  ;;  %838 = vst [vmem:[#allocation4 + $0x50] sm:$0xff] %v806_v39  ;;  %v819_v30 = vadd.f32 %v787_v46, %v2835_v27  ;;  %v820_v31 = vadd.f32 %v788_v8, %v2836_v29  ;;  %v821_v49 = vadd.f32 %v789_v20, %v2837_v37  ;;  %v2843_v59 = vld [vmem:[#allocation43_spill] sm:$0xff] }
 0x2d6   : > { %839 = vst [vmem:[#allocation4 + $0x58] sm:$0xff] %v807_v44  ;;  %840 = vst [vmem:[#allocation4 + $0x60] sm:$0xff] %v808_v28  ;;  %v822_v38 = vadd.f32 %v790_v63, %v2838_v42  ;;  %v823_v50 = vadd.f32 %v791_v32, %v2839_v43  ;;  %v824_v48 = vadd.f32 %v792_v25, %v2840_v41  ;;  %v860_v32 = vld [vmem:[#allocation3] sm:$0x1]  ;;  %v2844_v25 = vld [vmem:[#allocation24_spill] sm:$0xff] }
 0x2d7   : > { %841 = vst [vmem:[#allocation4 + $0x68] sm:$0xff] %v809_v53  ;;  %842 = vst [vmem:[#allocation4 + $0x70] sm:$0xff] %v810_v55  ;;  %v825_v36 = vadd.f32 %v793_v61, %v2841_v51  ;;  %v826_v47 = vadd.f32 %v794_v21, %v2842_v33  ;;  %v827_v40 = vadd.f32 %v795_v34, %v2843_v59  ;;  %v872_v1 = vld [vmem:[#allocation4] sm:$0xff] (!%p1457_p7) }
 0x2d8   : > { %843 = vst [vmem:[#allocation4 + $0x78] sm:$0xff] %v811_v4  ;;  %844 = vst [vmem:[#allocation4 + $0x80] sm:$0xff] %v812_v12  ;;  %v861_v63 = vmul.f32 %v2844_v25, %v860_v32  ;;  %v874_v57 = vld [vmem:[#allocation4 + $0x10] sm:$0xff] (!%p1457_p7)  ;;  %904 = vadd.xlane.f32.xlu0 (!%p1457_p7), %v872_v1  ;;  %v873_v46 = vld [vmem:[#allocation4 + $0x8] sm:$0xff] (!%p1457_p7) }
 0x2d9   : > { %845 = vst [vmem:[#allocation4 + $0x88] sm:$0xff] %v813_v18  ;;  %846 = vst [vmem:[#allocation4 + $0x90] sm:$0xff] %v814_v24  ;;  %908 = vadd.xlane.f32.xlu1 (!%p1457_p7), %v874_v57  ;;  %v875_v7 = vld [vmem:[#allocation4 + $0x18] sm:$0xff] (!%p1457_p7)  ;;  %v876_v20 = vld [vmem:[#allocation4 + $0x20] sm:$0xff] (!%p1457_p7) }
 0x2da   : > { %847 = vst [vmem:[#allocation4 + $0x98] sm:$0xff] %v815_v60  ;;  %848 = vst [vmem:[#allocation4 + $0xa0] sm:$0xff] %v816_v14  ;;  %v877_v8 = vld [vmem:[#allocation4 + $0x28] sm:$0xff] (!%p1457_p7)  ;;  %v878_v21 = vld [vmem:[#allocation4 + $0x30] sm:$0xff] (!%p1457_p7) }
 0x2db   : > { %849 = vst [vmem:[#allocation4 + $0xa8] sm:$0xff] %v817_v2  ;;  %850 = vst [vmem:[#allocation4 + $0xb0] sm:$0xff] %v818_v26  ;;  %v879_v61 = vld [vmem:[#allocation4 + $0x38] sm:$0xff] (!%p1457_p7)  ;;  %v880_v23 = vld [vmem:[#allocation4 + $0x40] sm:$0xff] (!%p1457_p7) }
 0x2dc   : > { %851 = vst [vmem:[#allocation4 + $0xb8] sm:$0xff] %v819_v30  ;;  %852 = vst [vmem:[#allocation4 + $0xc0] sm:$0xff] %v820_v31  ;;  %906 = vadd.xlane.f32.xlu0 (!%p1457_p7), %v873_v46  ;;  %v881_v34 = vld [vmem:[#allocation4 + $0x48] sm:$0xff] (!%p1457_p7)  ;;  %v882_v11 = vld [vmem:[#allocation4 + $0x50] sm:$0xff] (!%p1457_p7) }
 0x2dd   : > { %853 = vst [vmem:[#allocation4 + $0xc8] sm:$0xff] %v821_v49  ;;  %854 = vst [vmem:[#allocation4 + $0xd0] sm:$0xff] %v822_v38  ;;  %910 = vadd.xlane.f32.xlu1 (!%p1457_p7), %v875_v7  ;;  %v883_v35 = vld [vmem:[#allocation4 + $0x58] sm:$0xff] (!%p1457_p7)  ;;  %v884_v52 = vld [vmem:[#allocation4 + $0x60] sm:$0xff] (!%p1457_p7) }
 0x2de   : > { %855 = vst [vmem:[#allocation4 + $0xd8] sm:$0xff] %v823_v50  ;;  %856 = vst [vmem:[#allocation4 + $0xe0] sm:$0xff] %v824_v48  ;;  %v885_v17 = vld [vmem:[#allocation4 + $0x68] sm:$0xff] (!%p1457_p7)  ;;  %v886_v9 = vld [vmem:[#allocation4 + $0x70] sm:$0xff] (!%p1457_p7) }
 0x2df   : > { %857 = vst [vmem:[#allocation4 + $0xe8] sm:$0xff] %v825_v36  ;;  %858 = vst [vmem:[#allocation4 + $0xf0] sm:$0xff] %v826_v47  ;;  %v887_v3 = vld [vmem:[#allocation4 + $0x78] sm:$0xff] (!%p1457_p7)  ;;  %v888_v39 = vld [vmem:[#allocation4 + $0x80] sm:$0xff] (!%p1457_p7) }
 0x2e0   : > { %859 = vst [vmem:[#allocation4 + $0xf8] sm:$0xff] %v827_v40  ;;  %912 = vadd.xlane.f32.xlu0 (!%p1457_p7), %v876_v20  ;;  %v889_v5 = vld [vmem:[#allocation4 + $0x88] sm:$0xff] (!%p1457_p7)  ;;  %v890_v28 = vld [vmem:[#allocation4 + $0x90] sm:$0xff] (!%p1457_p7) }
 0x2e1   : > { %914 = vadd.xlane.f32.xlu1 (!%p1457_p7), %v877_v8  ;;  %v891_v44 = vld [vmem:[#allocation4 + $0x98] sm:$0xff] (!%p1457_p7)  ;;  %v892_v53 = vld [vmem:[#allocation4 + $0xa0] sm:$0xff] (!%p1457_p7) }
 0x2e2   : > { %v893_v45 = vld [vmem:[#allocation4 + $0xa8] sm:$0xff] (!%p1457_p7)  ;;  %v894_v55 = vld [vmem:[#allocation4 + $0xb0] sm:$0xff] (!%p1457_p7) }
 0x2e3   : > { %v895_v54 = vld [vmem:[#allocation4 + $0xb8] sm:$0xff] (!%p1457_p7)  ;;  %v896_v4 = vld [vmem:[#allocation4 + $0xc0] sm:$0xff] (!%p1457_p7) }
 0x2e4   : > { %916 = vadd.xlane.f32.xlu0 (!%p1457_p7), %v878_v21  ;;  %v897_v58 = vld [vmem:[#allocation4 + $0xc8] sm:$0xff] (!%p1457_p7)  ;;  %v898_v12 = vld [vmem:[#allocation4 + $0xd0] sm:$0xff] (!%p1457_p7) }
 0x2e5   : > { %918 = vadd.xlane.f32.xlu1 (!%p1457_p7), %v879_v61  ;;  %v899_v6 = vld [vmem:[#allocation4 + $0xd8] sm:$0xff] (!%p1457_p7)  ;;  %v900_v18 = vld [vmem:[#allocation4 + $0xe0] sm:$0xff] (!%p1457_p7) }
 0x2e6   : > { %v901_v13 = vld [vmem:[#allocation4 + $0xe8] sm:$0xff] (!%p1457_p7)  ;;  %v902_v24 = vld [vmem:[#allocation4 + $0xf0] sm:$0xff] (!%p1457_p7) }
 0x2e7   : > { %v903_v10 = vld [vmem:[#allocation4 + $0xf8] sm:$0xff] (!%p1457_p7)  ;;  %v2845_v19 = vld [vmem:[#allocation23_spill] sm:$0xff] (!%p1457_p7) }
 0x2e8   : > { %920 = vadd.xlane.f32.xlu0 (!%p1457_p7), %v880_v23 }
 0x2e9   : > { %922 = vadd.xlane.f32.xlu1 (!%p1457_p7), %v881_v34 }
 0x2ec   : > { %924 = vadd.xlane.f32.xlu0 (!%p1457_p7), %v882_v11 }
 0x2ed   : > { %926 = vadd.xlane.f32.xlu1 (!%p1457_p7), %v883_v35 }
 0x2f0   : > { %928 = vadd.xlane.f32.xlu0 (!%p1457_p7), %v884_v52 }
 0x2f1   : > { %930 = vadd.xlane.f32.xlu1 (!%p1457_p7), %v885_v17 }
 0x2f4   : > { %932 = vadd.xlane.f32.xlu0 (!%p1457_p7), %v886_v9 }
 0x2f5   : > { %934 = vadd.xlane.f32.xlu1 (!%p1457_p7), %v887_v3 }
 0x2f8   : > { %936 = vadd.xlane.f32.xlu0 (!%p1457_p7), %v888_v39 }
 0x2f9   : > { %938 = vadd.xlane.f32.xlu1 (!%p1457_p7), %v889_v5 }
 0x2fc   : > { %940 = vadd.xlane.f32.xlu0 (!%p1457_p7), %v890_v28 }
 0x2fd   : > { %942 = vadd.xlane.f32.xlu1 (!%p1457_p7), %v891_v44 }
 0x300   : > { %944 = vadd.xlane.f32.xlu0 (!%p1457_p7), %v892_v53 }
 0x301   : > { %946 = vadd.xlane.f32.xlu1 (!%p1457_p7), %v893_v45 }
 0x304   : > { %948 = vadd.xlane.f32.xlu0 (!%p1457_p7), %v894_v55 }
 0x305   : > { %950 = vadd.xlane.f32.xlu1 (!%p1457_p7), %v895_v54 }
 0x308   : > { %952 = vadd.xlane.f32.xlu0 (!%p1457_p7), %v896_v4 }
 0x309   : > { %954 = vadd.xlane.f32.xlu1 (!%p1457_p7), %v897_v58 }
 0x30c   : > { %956 = vadd.xlane.f32.xlu0 (!%p1457_p7), %v898_v12 }
 0x30d   : > { %958 = vadd.xlane.f32.xlu1 (!%p1457_p7), %v899_v6 }
 0x310   : > { %960 = vadd.xlane.f32.xlu0 (!%p1457_p7), %v900_v18 }
 0x311   : > { %962 = vadd.xlane.f32.xlu1 (!%p1457_p7), %v901_v13 }
 0x314   : > { %964 = vadd.xlane.f32.xlu0 (!%p1457_p7), %v902_v24 }
 0x315   : > { %966 = vadd.xlane.f32.xlu1 (!%p1457_p7), %v903_v10 }
 0x346   : > { %871 = sbr.rel (%p1457_p7) target bundleno = 1098 (0x44a), region = 60 }
 0x349   : > { %v863_v56 = vpop.xlane.xlu1 %862 }
 0x34a   : > { %v864_v0 = vadd.f32 %v863_v56, %v861_v63 }
 0x34c   : > { %866 = vst.msk [vmem:[#allocation3] sm:$0x1] %vm865_vm1, %v864_v0 }
 0x353   : > { %v968_v16 = vld [vmem:[#allocation3] sm:$0x1] }
 0x354   : > { %1705 = vrcp.f32 %v968_v16 }
 0x35e   : > { %v1706_v60 = vpop.eup %1705 }
 0x35f   : > { %v2503_v14 = vrot.slane %v1706_v60, %v2845_v19 }
 0x365   : > { %v905_v2 = vpop.xlane.xlu0 %904 }
 0x366   : > { %v909_v15 = vpop.xlane.xlu1 %908  ;;  %v976_v22 = vmul.f32 %v2503_v14, %v905_v2 }
 0x367   : > { %v978_v29 = vmul.f32 %v2503_v14, %v909_v15 }
 0x368   : > { %1042 = vperm.xlu0 %1703, %v976_v22  }
 0x369   : > { %v907_v27 = vpop.xlane.xlu0 %906 }
 0x36a   : > { %v911_v26 = vpop.xlane.xlu1 %910  ;;  %v977_v30 = vmul.f32 %v2503_v14, %v907_v27  ;;  %v1009_v27 = vld [vmem:[%s2766_s5 + $0x8] sm:$0xff] }
 0x36b   : > { %v979_v49 = vmul.f32 %v2503_v14, %v911_v26 }
 0x36c   : > { %1047 = vperm.xlu1 %1704, %v977_v30  }
 0x36d   : > { %v913_v37 = vpop.xlane.xlu0 %912 }
 0x36e   : > { %v915_v31 = vpop.xlane.xlu1 %914  ;;  %v980_v43 = vmul.f32 %v2503_v14, %v913_v37 }
 0x36f   : > { %v981_v51 = vmul.f32 %v2503_v14, %v915_v31  ;;  %v1010_v31 = vld [vmem:[%s2766_s5 + $0x10] sm:$0xff] }
 0x370   : > { %1052 = vperm.xlu1 %1704, %v978_v29   ;;  %v1008_v29 = vld [vmem:[%s2766_s5] sm:$0xff] }
 0x371   : > { %v917_v38 = vpop.xlane.xlu0 %916 }
 0x372   : > { %v919_v42 = vpop.xlane.xlu1 %918  ;;  %v982_v59 = vmul.f32 %v2503_v14, %v917_v38 }
 0x373   : > { %v983_v63 = vmul.f32 %v2503_v14, %v919_v42 }
 0x374   : > { %1057 = vperm.xlu1 %1704, %v979_v49  }
 0x375   : > { %v921_v41 = vpop.xlane.xlu0 %920 }
 0x376   : > { %v923_v50 = vpop.xlane.xlu1 %922  ;;  %v984_v1 = vmul.f32 %v2503_v14, %v921_v41 }
 0x377   : > { %v985_v48 = vmul.f32 %v2503_v14, %v923_v50  ;;  %v1012_v50 = vld [vmem:[%s2766_s5 + $0x20] sm:$0xff] }
 0x378   : > { %1062 = vperm.xlu1 %1704, %v980_v43  }
 0x379   : > { %1087 = vperm.xlu0 %1703, %v985_v48   ;;  %v925_v33 = vpop.xlane.xlu0 %924 }
 0x37a   : > { %v927_v36 = vpop.xlane.xlu1 %926  ;;  %v986_v20 = vmul.f32 %v2503_v14, %v925_v33 }
 0x37b   : > { %v987_v47 = vmul.f32 %v2503_v14, %v927_v36 }
 0x37c   : > { %1067 = vperm.xlu1 %1704, %v981_v51   ;;  %v1013_v51 = vld [vmem:[%s2766_s5 + $0x28] sm:$0xff] }
 0x37d   : > { %1097 = vperm.xlu0 %1703, %v987_v47   ;;  %v929_v32 = vpop.xlane.xlu0 %928 }
 0x37e   : > { %v931_v40 = vpop.xlane.xlu1 %930  ;;  %v988_v23 = vmul.f32 %v2503_v14, %v929_v32 }
 0x37f   : > { %v989_v25 = vmul.f32 %v2503_v14, %v931_v40 }
 0x380   : > { %1072 = vperm.xlu1 %1704, %v982_v59  }
 0x381   : > { %1107 = vperm.xlu0 %1703, %v989_v25   ;;  %v933_v0 = vpop.xlane.xlu0 %932  ;;  %v1014_v25 = vld [vmem:[%s2766_s5 + $0x30] sm:$0xff] }
 0x382   : > { %v935_v56 = vpop.xlane.xlu1 %934  ;;  %v990_v17 = vmul.f32 %v2503_v14, %v933_v0 }
 0x383   : > { %v991_v57 = vmul.f32 %v2503_v14, %v935_v56 }
 0x384   : > { %1077 = vperm.xlu1 %1704, %v983_v63  }
 0x385   : > { %1117 = vperm.xlu0 %1703, %v991_v57   ;;  %v937_v46 = vpop.xlane.xlu0 %936 }
 0x386   : > { %v939_v7 = vpop.xlane.xlu1 %938  ;;  %v992_v9 = vmul.f32 %v2503_v14, %v937_v46 }
 0x387   : > { %v993_v8 = vmul.f32 %v2503_v14, %v939_v7 }
 0x388   : > { %1082 = vperm.xlu1 %1704, %v984_v1  }
 0x389   : > { %1127 = vperm.xlu0 %1703, %v993_v8   ;;  %v941_v21 = vpop.xlane.xlu0 %940 }
 0x38a   : > { %v943_v61 = vpop.xlane.xlu1 %942  ;;  %v994_v28 = vmul.f32 %v2503_v14, %v941_v21 }
 0x38b   : > { %v995_v34 = vmul.f32 %v2503_v14, %v943_v61 }
 0x38c   : > { %1092 = vperm.xlu1 %1704, %v986_v20   ;;  %v1015_v20 = vld [vmem:[%s2766_s5 + $0x38] sm:$0xff] }
 0x38d   : > { %1137 = vperm.xlu0 %1703, %v995_v34   ;;  %v945_v11 = vpop.xlane.xlu0 %944 }
 0x38e   : > { %v947_v62 = vpop.xlane.xlu1 %946  ;;  %v996_v55 = vmul.f32 %v2503_v14, %v945_v11  ;;  %v1017_v11 = vld [vmem:[%s2766_s5 + $0x48] sm:$0xff] }
 0x38f   : > { %v997_v35 = vmul.f32 %v2503_v14, %v947_v62 }
 0x390   : > { %1102 = vperm.xlu1 %1704, %v988_v23  }
 0x391   : > { %1147 = vperm.xlu0 %1703, %v997_v35   ;;  %v949_v39 = vpop.xlane.xlu0 %948 }
 0x392   : > { %v951_v52 = vpop.xlane.xlu1 %950  ;;  %v998_v6 = vmul.f32 %v2503_v14, %v949_v39 }
 0x393   : > { %v999_v3 = vmul.f32 %v2503_v14, %v951_v52  ;;  %v1016_v52 = vld [vmem:[%s2766_s5 + $0x40] sm:$0xff] }
 0x394   : > { %1112 = vperm.xlu1 %1704, %v990_v17  }
 0x395   : > { %1157 = vperm.xlu0 %1703, %v999_v3   ;;  %v953_v54 = vpop.xlane.xlu0 %952 }
 0x396   : > { %v955_v5 = vpop.xlane.xlu1 %954  ;;  %v1000_v10 = vmul.f32 %v2503_v14, %v953_v54  ;;  %v1018_v54 = vld [vmem:[%s2766_s5 + $0x50] sm:$0xff] }
 0x397   : > { %v1001_v44 = vmul.f32 %v2503_v14, %v955_v5 }
 0x398   : > { %1122 = vperm.xlu1 %1704, %v992_v9  }
 0x399   : > { %1167 = vperm.xlu0 %1703, %v1001_v44   ;;  %v957_v13 = vpop.xlane.xlu0 %956 }
 0x39a   : > { %v959_v45 = vpop.xlane.xlu1 %958  ;;  %v1002_v16 = vmul.f32 %v2503_v14, %v957_v13 }
 0x39b   : > { %v1003_v53 = vmul.f32 %v2503_v14, %v959_v45  ;;  %v1019_v45 = vld [vmem:[%s2766_s5 + $0x58] sm:$0xff] }
 0x39c   : > { %1132 = vperm.xlu1 %1704, %v994_v28  }
 0x39d   : > { %1177 = vperm.xlu0 %1703, %v1003_v53   ;;  %v961_v24 = vpop.xlane.xlu0 %960 }
 0x39e   : > { %v963_v58 = vpop.xlane.xlu1 %962  ;;  %v1004_v60 = vmul.f32 %v2503_v14, %v961_v24 }
 0x39f   : > { %v1005_v4 = vmul.f32 %v2503_v14, %v963_v58 }
 0x3a0   : > { %1142 = vperm.xlu1 %1704, %v996_v55  }
 0x3a1   : > { %1187 = vperm.xlu0 %1703, %v1005_v4   ;;  %v965_v19 = vpop.xlane.xlu0 %964 }
 0x3a2   : > { %v967_v12 = vpop.xlane.xlu1 %966  ;;  %v1006_v15 = vmul.f32 %v2503_v14, %v965_v19 }
 0x3a3   : > { %v1007_v18 = vmul.f32 %v2503_v14, %v967_v12  ;;  %v1011_v14 = vld [vmem:[%s2766_s5 + $0x18] sm:$0xff] }
 0x3a4   : > { %1152 = vperm.xlu1 %1704, %v998_v6  }
 0x3a5   : > { %1197 = vperm.xlu0 %1703, %v1007_v18   ;;  %v1021_v18 = vld [vmem:[%s2766_s5 + $0x68] sm:$0xff] }
 0x3a8   : > { %1162 = vperm.xlu1 %1704, %v1000_v10  }
 0x3ac   : > { %1172 = vperm.xlu1 %1704, %v1002_v16   ;;  %v1020_v16 = vld [vmem:[%s2766_s5 + $0x60] sm:$0xff] }
 0x3b0   : > { %1182 = vperm.xlu1 %1704, %v1004_v60  }
 0x3b4   : > { %1192 = vperm.xlu1 %1704, %v1006_v15  }
 0x3e7   : > { %v1043_v26 = vpop.permute.xlu0 %1042 }
 0x3e8   : > { %v1200_v38 = vmul.f32 %v1043_v26, %v1008_v29  ;;  %v1022_v29 = vld [vmem:[%s2766_s5 + $0x70] sm:$0xff] }
 0x3ea   : > { %v1233_v47 = vsel %vm1232_vm2, %v1200_v38, 0.0 }
 0x3eb   : > { %v1048_v2 = vpop.permute.xlu1 %1047 }
 0x3ec   : > { %v1201_v37 = vmul.f32 %v1048_v2, %v1009_v27  ;;  %v1023_v27 = vld [vmem:[%s2766_s5 + $0x78] sm:$0xff] }
 0x3ee   : > { %v1234_v41 = vsel %vm1232_vm2, %v1201_v37, 0.0 }
 0x3ef   : > { %v1053_v22 = vpop.permute.xlu1 %1052  ;;  %v1235_v32 = vadd.f32 %v1234_v41, %v1233_v47 }
 0x3f0   : > { %v1202_v43 = vmul.f32 %v1053_v22, %v1010_v31 }
 0x3f2   : > { %v1236_v59 = vsel %vm1232_vm2, %v1202_v43, 0.0 }
 0x3f3   : > { %v1058_v30 = vpop.permute.xlu1 %1057  ;;  %v1237_v0 = vadd.f32 %v1236_v59, %v1235_v32  ;;  %v1027_v32 = vld [vmem:[%s2766_s5 + $0x98] sm:$0xff] }
 0x3f4   : > { %v1203_v48 = vmul.f32 %v1058_v30, %v1011_v14 }
 0x3f6   : > { %v1238_v63 = vsel %vm1232_vm2, %v1203_v48, 0.0  ;;  %v1024_v48 = vld [vmem:[%s2766_s5 + $0x80] sm:$0xff] }
 0x3f7   : > { %v1063_v49 = vpop.permute.xlu1 %1062  ;;  %v1239_v8 = vadd.f32 %v1238_v63, %v1237_v0 }
 0x3f8   : > { %v1088_v42 = vpop.permute.xlu0 %1087  ;;  %v1204_v40 = vmul.f32 %v1063_v49, %v1012_v50  ;;  %v1025_v50 = vld [vmem:[%s2766_s5 + $0x88] sm:$0xff] }
 0x3f9   : > { %v1209_v44 = vmul.f32 %v1088_v42, %v1017_v11 }
 0x3fa   : > { %v1240_v7 = vsel %vm1232_vm2, %v1204_v40, 0.0 }
 0x3fb   : > { %v1068_v36 = vpop.permute.xlu1 %1067  ;;  %v1241_v21 = vadd.f32 %v1240_v7, %v1239_v8  ;;  %v1250_v6 = vsel %vm1232_vm2, %v1209_v44, 0.0 }
 0x3fc   : > { %v1098_v33 = vpop.permute.xlu0 %1097  ;;  %v1205_v56 = vmul.f32 %v1068_v36, %v1013_v51 }
 0x3fd   : > { %v1211_v12 = vmul.f32 %v1098_v33, %v1019_v45 }
 0x3fe   : > { %v1242_v61 = vsel %vm1232_vm2, %v1205_v56, 0.0  ;;  %v1026_v56 = vld [vmem:[%s2766_s5 + $0x90] sm:$0xff] }
 0x3ff   : > { %v1073_v57 = vpop.permute.xlu1 %1072  ;;  %v1243_v17 = vadd.f32 %v1242_v61, %v1241_v21  ;;  %v1254_v2 = vsel %vm1232_vm2, %v1211_v12, 0.0  ;;  %v1028_v21 = vld [vmem:[%s2766_s5 + $0xa0] sm:$0xff] }
 0x400   : > { %v1108_v1 = vpop.permute.xlu0 %1107  ;;  %v1206_v46 = vmul.f32 %v1073_v57, %v1014_v25 }
 0x401   : > { %v1213_v22 = vmul.f32 %v1108_v1, %v1021_v18 }
 0x402   : > { %v1244_v62 = vsel %vm1232_vm2, %v1206_v46, 0.0 }
 0x403   : > { %v1078_v34 = vpop.permute.xlu1 %1077  ;;  %v1245_v9 = vadd.f32 %v1244_v62, %v1243_v17  ;;  %v1258_v42 = vsel %vm1232_vm2, %v1213_v22, 0.0 }
 0x404   : > { %v1118_v23 = vpop.permute.xlu0 %1117  ;;  %v1207_v35 = vmul.f32 %v1078_v34, %v1015_v20  ;;  %v1029_v20 = vld [vmem:[%s2766_s5 + $0xa8] sm:$0xff] }
 0x405   : > { %v1215_v38 = vmul.f32 %v1118_v23, %v1023_v27 }
 0x406   : > { %v1246_v3 = vsel %vm1232_vm2, %v1207_v35, 0.0 }
 0x407   : > { %v1083_v5 = vpop.permute.xlu1 %1082  ;;  %v1247_v53 = vadd.f32 %v1246_v3, %v1245_v9  ;;  %v1262_v47 = vsel %vm1232_vm2, %v1215_v38, 0.0  ;;  %v1031_v3 = vld [vmem:[%s2766_s5 + $0xb8] sm:$0xff] }
 0x408   : > { %v1128_v39 = vpop.permute.xlu0 %1127  ;;  %v1208_v28 = vmul.f32 %v1083_v5, %v1016_v52  ;;  %v1030_v5 = vld [vmem:[%s2766_s5 + $0xb0] sm:$0xff] }
 0x409   : > { %v1217_v59 = vmul.f32 %v1128_v39, %v1025_v50 }
 0x40a   : > { %v1248_v55 = vsel %vm1232_vm2, %v1208_v28, 0.0 }
 0x40b   : > { %v1249_v58 = vadd.f32 %v1248_v55, %v1247_v53  ;;  %v1093_v4 = vpop.permute.xlu1 %1092  ;;  %v1266_v7 = vsel %vm1232_vm2, %v1217_v59, 0.0  ;;  %v1033_v55 = vld [vmem:[%s2766_s5 + $0xc8] sm:$0xff] }
 0x40c   : > { %v1210_v13 = vmul.f32 %v1093_v4, %v1018_v54  ;;  %v1138_v24 = vpop.permute.xlu0 %1137 }
 0x40d   : > { %v1251_v10 = vadd.f32 %v1250_v6, %v1249_v58  ;;  %v1219_v46 = vmul.f32 %v1138_v24, %v1027_v32  ;;  %v1032_v6 = vld [vmem:[%s2766_s5 + $0xc0] sm:$0xff] }
 0x40e   : > { %v1252_v60 = vsel %vm1232_vm2, %v1210_v13, 0.0 }
 0x40f   : > { %v1253_v19 = vadd.f32 %v1252_v60, %v1251_v10  ;;  %v1103_v15 = vpop.permute.xlu1 %1102  ;;  %v1270_v11 = vsel %vm1232_vm2, %v1219_v46, 0.0  ;;  %v1035_v60 = vld [vmem:[%s2766_s5 + $0xd8] sm:$0xff] }
 0x410   : > { %v1212_v26 = vmul.f32 %v1103_v15, %v1020_v16  ;;  %v1148_v14 = vpop.permute.xlu0 %1147  ;;  %v1034_v15 = vld [vmem:[%s2766_s5 + $0xd0] sm:$0xff] }
 0x411   : > { %v1255_v30 = vadd.f32 %v1254_v2, %v1253_v19  ;;  %v1221_v17 = vmul.f32 %v1148_v14, %v1029_v20 }
 0x412   : > { %v1256_v31 = vsel %vm1232_vm2, %v1212_v26, 0.0 }
 0x413   : > { %v1257_v37 = vadd.f32 %v1256_v31, %v1255_v30  ;;  %v1113_v49 = vpop.permute.xlu1 %1112  ;;  %v1274_v45 = vsel %vm1232_vm2, %v1221_v17, 0.0 }
 0x414   : > { %v1214_v43 = vmul.f32 %v1113_v49, %v1022_v29  ;;  %v1158_v25 = vpop.permute.xlu0 %1157  ;;  %v1036_v49 = vld [vmem:[%s2766_s5 + $0xe0] sm:$0xff] }
 0x415   : > { %v1259_v41 = vadd.f32 %v1258_v42, %v1257_v37  ;;  %v1223_v53 = vmul.f32 %v1158_v25, %v1031_v3  ;;  %v1037_v37 = vld [vmem:[%s2766_s5 + $0xe8] sm:$0xff] }
 0x416   : > { %v1260_v51 = vsel %vm1232_vm2, %v1214_v43, 0.0 }
 0x417   : > { %v1261_v36 = vadd.f32 %v1260_v51, %v1259_v41  ;;  %v1123_v33 = vpop.permute.xlu1 %1122  ;;  %v1278_v10 = vsel %vm1232_vm2, %v1223_v53, 0.0  ;;  %v1039_v51 = vld [vmem:[%s2766_s5 + $0xf8] sm:$0xff] }
 0x418   : > { %v1216_v40 = vmul.f32 %v1123_v33, %v1024_v48  ;;  %v1168_v23 = vpop.permute.xlu0 %1167 }
 0x419   : > { %v1263_v63 = vadd.f32 %v1262_v47, %v1261_v36  ;;  %v1225_v24 = vmul.f32 %v1168_v23, %v1033_v55  ;;  %v1038_v47 = vld [vmem:[%s2766_s5 + $0xf0] sm:$0xff]  ;;  %v1302_v23 = vld [vmem:[%s2767_s6] sm:$0x1] }
 0x41a   : > { %v1264_v0 = vsel %vm1232_vm2, %v1216_v40, 0.0 }
 0x41b   : > { %v1265_v57 = vadd.f32 %v1264_v0, %v1263_v63  ;;  %v1133_v1 = vpop.permute.xlu1 %1132  ;;  %v1282_v30 = vsel %vm1232_vm2, %v1225_v24, 0.0 }
 0x41c   : > { %v1218_v8 = vmul.f32 %v1133_v1, %v1026_v56  ;;  %v1178_v58 = vpop.permute.xlu0 %1177 }
 0x41d   : > { %v1267_v61 = vadd.f32 %v1266_v7, %v1265_v57  ;;  %v1227_v29 = vmul.f32 %v1178_v58, %v1035_v60 }
 0x41e   : > { %v1268_v34 = vsel %vm1232_vm2, %v1218_v8, 0.0 }
 0x41f   : > { %v1269_v62 = vadd.f32 %v1268_v34, %v1267_v61  ;;  %v1143_v35 = vpop.permute.xlu1 %1142  ;;  %v1286_v50 = vsel %vm1232_vm2, %v1227_v29, 0.0 }
 0x420   : > { %v1220_v52 = vmul.f32 %v1143_v35, %v1028_v21  ;;  %v1188_v22 = vpop.permute.xlu0 %1187 }
 0x421   : > { %v1271_v9 = vadd.f32 %v1270_v11, %v1269_v62  ;;  %v1229_v41 = vmul.f32 %v1188_v22, %v1037_v37 }
 0x422   : > { %v1272_v39 = vsel %vm1232_vm2, %v1220_v52, 0.0 }
 0x423   : > { %v1273_v44 = vadd.f32 %v1272_v39, %v1271_v9  ;;  %v1153_v28 = vpop.permute.xlu1 %1152  ;;  %v1290_v25 = vsel %vm1232_vm2, %v1229_v41, 0.0 }
 0x424   : > { %v1222_v54 = vmul.f32 %v1153_v28, %v1030_v5  ;;  %v1198_v36 = vpop.permute.xlu0 %1197 }
 0x425   : > { %v1275_v4 = vadd.f32 %v1274_v45, %v1273_v44  ;;  %v1231_v63 = vmul.f32 %v1198_v36, %v1039_v51 }
 0x426   : > { %v1276_v12 = vsel %vm1232_vm2, %v1222_v54, 0.0 }
 0x427   : > { %v1277_v13 = vadd.f32 %v1276_v12, %v1275_v4  ;;  %v1163_v18 = vpop.permute.xlu1 %1162  ;;  %v1294_v7 = vsel %vm1232_vm2, %v1231_v63, 0.0 }
 0x428   : > { %v1224_v16 = vmul.f32 %v1163_v18, %v1032_v6 }
 0x429   : > { %v1279_v19 = vadd.f32 %v1278_v10, %v1277_v13 }
 0x42a   : > { %v1280_v2 = vsel %vm1232_vm2, %v1224_v16, 0.0 }
 0x42b   : > { %v1281_v26 = vadd.f32 %v1280_v2, %v1279_v19  ;;  %v1173_v27 = vpop.permute.xlu1 %1172 }
 0x42c   : > { %v1226_v31 = vmul.f32 %v1173_v27, %v1034_v15 }
 0x42d   : > { %v1283_v14 = vadd.f32 %v1282_v30, %v1281_v26 }
 0x42e   : > { %v1284_v42 = vsel %vm1232_vm2, %v1226_v31, 0.0 }
 0x42f   : > { %v1285_v38 = vadd.f32 %v1284_v42, %v1283_v14  ;;  %v1183_v43 = vpop.permute.xlu1 %1182 }
 0x430   : > { %v1228_v48 = vmul.f32 %v1183_v43, %v1036_v49 }
 0x431   : > { %v1287_v33 = vadd.f32 %v1286_v50, %v1285_v38 }
 0x432   : > { %v1288_v59 = vsel %vm1232_vm2, %v1228_v48, 0.0 }
 0x433   : > { %v1289_v40 = vadd.f32 %v1288_v59, %v1287_v33  ;;  %v1193_v32 = vpop.permute.xlu1 %1192 }
 0x434   : > { %v1230_v56 = vmul.f32 %v1193_v32, %v1038_v47 }
 0x435   : > { %v1291_v0 = vadd.f32 %v1290_v25, %v1289_v40 }
 0x436   : > { %v1292_v57 = vsel %vm1232_vm2, %v1230_v56, 0.0 }
 0x437   : > { %v1293_v1 = vadd.f32 %v1292_v57, %v1291_v0 }
 0x439   : > { %v1295_v46 = vadd.f32 %v1294_v7, %v1293_v1 }
 0x43b   : > { %v1296_v8 = vrot.slane %v1295_v46, 4 }
 0x43d   : > { %v1297_v20 = vadd.f32 %v1296_v8, %v1295_v46 }
 0x43f   : > { %v1298_v61 = vrot.slane %v1297_v20, 2 }
 0x441   : > { %v1299_v21 = vadd.f32 %v1298_v61, %v1297_v20 }
 0x443   : > { %v1300_v34 = vrot.slane %v1299_v21, 1 }
 0x445   : > { %v1301_v62 = vadd.f32 %v1300_v34, %v1299_v21 }
 0x447   : > { %v1303_v35 = vadd.f32 %v1302_v23, %v1301_v62 }
 0x449   : > { %1305 = vst.msk [vmem:[%s2133_s12] sm:$0x1] %vm1304_vm3, %v1303_v35 }
 0x44a PF: > { %s1458_s19 = sshll.u32 %s1879_s4, 4  ;;  %s1323_s25 = sshll.u32 %s2133_s12, 4  ;;  %s1324_s25 = int_to_ptr.vmem [resolvable:$true] %s1323_s25 }
 0x44b   : > { %s2673_s18 = scalar_lea.hbm %s2768_s7, %s1458_s19  ;;  %s2846_s8 = sand.u32 1, %s1855_s30  }
 0x44c   : > { %s1307_s24 = scalar_lea.sflag [#allocation8], %s2846_s8  ;;  %s1737_s9 = scalar_lea.vmem %s1324_s25, 16 }
 0x44d   : > { %p1738_p2 = scmp.ne.s32.totalorder %s1324_s25, %s1737_s9  ;;  %p2847_p1 = scmp.ne.s32.totalorder %s2794_s28, 0 }
 0x44e   : > { %s1901_s26 = smov [#allocation9]  }
 0x44f   : > { %p1739_p11 = pnand %p1738_p2, %p2847_p1  ;;  %s1741_s29 = sshll.u32 %s1901_s26, 4  ;;  %s1742_s29 = int_to_ptr.vmem [resolvable:$false] %s1741_s29 }
 0x450   : > { %s1743_s20 = scalar_lea.vmem %s1742_s29, 32  ;;  %p1744_p5 = scmp.lt.s32.totalorder %s1324_s25, %s1742_s29 }
 0x451   : > { %p1740_p8 = pneg %p1739_p11  ;;  %p1745_p10 = scmp.lt.s32.totalorder %s1743_s20, %s1737_s9 }
 0x453   : > { %p1746_p3 = por %p1745_p10, %p1744_p5 }
 0x455   : > { %p1747_p13 = pnand %p1746_p3, %p1740_p8 }
 0x457   : > { %1750 = shalt.err (!%p1747_p13)
}
 0x458   : > { %s1751_s12 = scalar_lea.hbm %s2673_s18, 16  ;;  %s1755_s21 = scalar_lea.hbm %s2768_s7, 32 }
 0x459   : > { %p1752_p0 = scmp.ne.s32.totalorder %s2673_s18, %s1751_s12  ;;  %p1756_p9 = scmp.lt.u32.totalorder %s2673_s18, %s2768_s7 }
 0x45a   : > { %p1757_p12 = scmp.lt.u32.totalorder %s1755_s21, %s1751_s12  ;;  %p1759_p2 = scmp.lt.u32.totalorder %s1751_s12, %s2673_s18 }
 0x45b   : > { %p1753_p4 = pnand %p1752_p0, %p2847_p1 }
 0x45c   : > { %p1758_p7 = por %p1757_p12, %p1756_p9 }
 0x45d   : > { %p1754_p6 = pneg %p1753_p4 }
 0x45e   : > { %p1760_p11 = por %p1759_p2, %p1758_p7 }
 0x460   : > { %p1761_p8 = pnand %p1760_p11, %p1754_p6 }
 0x462   : > { %1764 = shalt.err (!%p1761_p8)
}
 0x463   : > { %s2848_s20 = sld [smem:[#allocation22_spill]]  ;;  %s1459_s9 = sshll.u32 %s1879_s4, 1 }
 0x464   : > { %1569 = dma.vmem_to_hbm [thread:$0]  (%p2847_p1), %s1324_s25, 16, %s2673_s18, %s1307_s24  }
 0x465   : > { %s2849_s29 = scalar_lea.vmem [#allocation10], %s2120_s27  ;;  %s1334_s23 = sadd.s32 %s1875_s13, %s1459_s9 }
 0x466   : > { %s1338_s19 = sshll.u32 %s2849_s29, 4  ;;  %s1460_s12 = sshll.u32 %s1334_s23, 4  ;;  %s2699_s19 = int_to_ptr.vmem [resolvable:$true] %s1338_s19 }
 0x467   : > { %s2850_s28 = sld [smem:[#allocation46_spill]]  ;;  %s1311_s0 = scalar_lea.sflag [#allocation11], %s2120_s27 }
 0x468   : > { %s1765_s1 = scalar_lea.vmem %s2699_s19, 16  ;;  %s1902_s4 = smov [#allocation10]  }
 0x469   : > { %p1766_p5 = scmp.ne.s32.totalorder %s2699_s19, %s1765_s1  ;;  %p2851_p10 = scmp.ne.s32.totalorder %s2848_s20, 0 }
 0x46a   : > { %s1769_s18 = sshll.u32 %s1902_s4, 4  ;;  %s1770_s18 = int_to_ptr.vmem [resolvable:$false] %s1769_s18 }
 0x46b   : > { %p1767_p3 = pnand %p1766_p5, %p2851_p10  ;;  %s1771_s13 = scalar_lea.vmem %s1770_s18, 32 }
 0x46c   : > { %p1772_p13 = scmp.lt.s32.totalorder %s2699_s19, %s1770_s18  ;;  %p1773_p0 = scmp.lt.s32.totalorder %s1771_s13, %s1765_s1 }
 0x46d   : > { %s1336_s26 = scalar_lea.hbm %s2850_s28, %s1460_s12  ;;  %p1768_p1 = pneg %p1767_p3 }
 0x46e   : > { %p1774_p4 = por %p1773_p0, %p1772_p13 }
 0x470   : > { %p1775_p6 = pnand %p1774_p4, %p1768_p1 }
 0x472   : > { %1778 = shalt.err (!%p1775_p6)
}
 0x473   : > { %s1779_s25 = scalar_lea.hbm %s1336_s26, 16  ;;  %s1783_s9 = scalar_lea.hbm %s2850_s28, 64 }
 0x474   : > { %p1780_p9 = scmp.ne.s32.totalorder %s1336_s26, %s1779_s25  ;;  %p1784_p2 = scmp.lt.u32.totalorder %s1336_s26, %s2850_s28 }
 0x475   : > { %p1785_p11 = scmp.lt.u32.totalorder %s1783_s9, %s1779_s25  ;;  %p1787_p5 = scmp.lt.u32.totalorder %s1779_s25, %s1336_s26 }
 0x476   : > { %p1781_p12 = pnand %p1780_p9, %p2851_p10 }
 0x477   : > { %p1786_p8 = por %p1785_p11, %p1784_p2 }
 0x478   : > { %p1782_p7 = pneg %p1781_p12 }
 0x479   : > { %p1788_p3 = por %p1787_p5, %p1786_p8 }
 0x47b   : > { %p1789_p1 = pnand %p1788_p3, %p1782_p7 }
 0x47d   : > { %1792 = shalt.err (!%p1789_p1)
}
 0x47e   : > { %1570 = dma.vmem_to_hbm [thread:$0]  (%p2851_p10), %s2699_s19, 16, %s1336_s26, %s1311_s0  }
 0x47f PF: > { %s2852_s1 = sld [smem:[#allocation15_spill]]  ;;  %p1585_p13 = scmp.ge.s32.totalorder %s1891_s16, 2 }
 0x480   : > { %p2853_p0 = scmp.ne.s32.totalorder %s2799_s17, 0 }
 0x482   : > { %p1578_p4 = pnand %p1585_p13, %p2853_p0 }
 0x485   : > { %s1350_s12 = sand.u32 1, %s2852_s1  }
 0x486   : > { %s1351_s21 = scalar_lea.sflag [#allocation8], %s1350_s12 }
 0x487   : > { %1842 = dma.done.wait (!%p1578_p4), %s1351_s21, 16  }
 0x488   : > { %1844 = vsyncadd (!%p1578_p4), %s1351_s21, 4294967280  ;;  %s1358_s8 = sand.u32 1, %s1863_s10   ;;  %p2854_p6 = scmp.ne.s32.totalorder %s2800_s22, 0 }
 0x489   : > { %s1359_s4 = scalar_lea.sflag [#allocation11], %s1358_s8 }
 0x48a   : > { %p1581_p9 = pnand %p1585_p13, %p2854_p6 }
 0x48c   : > { %1846 = dma.done.wait (!%p1581_p9), %s1359_s4, 16  }
 0x48d   : > { %1848 = vsyncadd (!%p1581_p9), %s1359_s4, 4294967280  ;;  %s29_s16 = sadd.s32 1, %s1891_s16   ;;  %s2855_s0 = sld [smem:[#allocation16_spill]] }
 0x48e   : > { %p26_p10 = scmp.ge.s32.totalorder %s29_s16, 6   ;;  %s2856_s9 = sld [smem:[#allocation20_spill]] }
 0x48f   : > { %s2857_s17 = sld [smem:[#allocation17_spill]]  ;;  %s2858_s12 = sld [smem:[#allocation21_spill]] }
 0x490   : > { %s2859_s20 = sld [smem:[#allocation18_spill]]  ;;  %s2860_s19 = sld [smem:[#allocation19_spill]] }
 0x491   : > { %s2861_s29 = smov %s1855_s30  ;;  %s2863_s10 = smov %s1867_s11 }
 0x492   : > { %s2865_s13 = smov %s1883_s14  ;;  %s2866_s4 = smov %s1887_s15 }
 0x493   : > { %s2862_s30 = smov %s2855_s0  ;;  %28 = sbr.rel (!%p26_p10) target bundleno = 16 (0x10), region = 118 }
 0x495   : > { %s2864_s11 = smov %s2857_s17 }
 0x496   : > { %s2867_s14 = smov %s2859_s20  ;;  %s2868_s15 = smov %s2860_s19 }
 0x49a   :  { %1363 = vsyncpa [#allocation7], 1 }
 0x49b   :  { %1365 = vsyncpa [#allocation7 + $0x1], 1 }
 0x49c   :  { %1366 = vsyncpa [#allocation8], 1 }
 0x49d   :  { %1368 = vsyncpa [#allocation8 + $0x1], 1 }
 0x49e   :  { %1369 = vsyncpa [#allocation11], 1 }
 0x49f   :  { %1371 = vsyncpa [#allocation11 + $0x1], 1 }

</bundles_post_ra>
